<compile_context>
chip_gen: v5e
topology: v5e:2x2
jax: 0.10.0
libtpu: 0.0.40
codegen_flags: <defaults>
</compile_context>

<pallas_src>
import numpy as np
import jax
import jax.numpy as jnp
from jax.experimental import pallas as pl
from jax.experimental.pallas import tpu as pltpu


def _pick_bt(B, N):
    """Images per grid step: large enough to amortize ~0.35us/step overhead and
    fill the MXU lanes, small enough to keep >= 2 parallel grid steps (v7x has
    2 TensorCores) and keep the im2col scratch + f32 intermediates tiny vs VMEM."""
    bt = min(max(1, 1024 // N), max(1, B // 2))
    while B % bt:
        bt -= 1
    return bt
    # TODO(synk): for B == 1, split the spatial/lane axis over two parallel grid
    # steps so both v7x TensorCores get work.


def _make_kernel(H, W, C, Bt):
    N = H * W
    # roll amount per tap k = (dh+1)*3 + (dw+1); out[:, p] needs in[:, p + dh*W + dw]
    shifts = [(-(dh * W + dw)) % N for dh in (-1, 0, 1) for dw in (-1, 0, 1)]

    def kernel(x_ref, mask_ref, w1_ref, b1_ref, w2_ref, b2_ref,
               wa1_ref, ba1_ref, wa2_ref, ba2_ref, o_ref, col_ref):
        # x_ref: (Bt, C, N) f32      mask_ref: (9, N) f32 (0/1 validity per tap)
        # w*_ref: bf16 weights       b*_ref: f32 biases (BN folded into conv1/2)
        # col_ref: (9*C, Bt*N) bf16 VMEM scratch -- the im2col slab.

        def build_cols(get_img):
            # Stage the 9 rolled+masked taps of every image into the scratch:
            #   col[k*C:(k+1)*C, b*N:(b+1)*N] = tap k of image b (bf16)
            for b in range(Bt):
                img = get_img(b)                                  # (C, N) f32
                for k, shift in enumerate(shifts):
                    if shift == 0:                                # centre tap, all valid
                        t = img
                    else:
                        t = (pltpu.roll(img, shift=shift, axis=1)
                             * mask_ref[pl.ds(k, 1), :])          # exact zero padding
                    col_ref[pl.ds(k * C, C), pl.ds(b * N, N)] = t.astype(jnp.bfloat16)

        def conv3x3(w_ref, b_ref):
            # One K = 9*C bf16 MXU matmul with f32 accumulation (BN folded in).
            return jnp.dot(w_ref[...], col_ref[...],
                           preferred_element_type=jnp.float32) + b_ref[...]

        build_cols(lambda b: x_ref[b])
        h1 = jnp.maximum(conv3x3(w1_ref, b1_ref), 0.0)            # relu(bn1(conv1(x)))
        build_cols(lambda b: h1[:, b * N:(b + 1) * N])
        h2 = conv3x3(w2_ref, b2_ref)                              # bn2(conv2(h1))

        # AttentionModule: avg_pool2d(h2, 1) is the identity; the 1x1 convs are
        # per-pixel channel matmuls (channels on sublanes, spatial on lanes).
        a = jnp.dot(wa1_ref[...], h2.astype(jnp.bfloat16),
                    preferred_element_type=jnp.float32) + ba1_ref[...]
        a = jnp.maximum(a, 0.0)
        att = jax.nn.sigmoid(jnp.dot(wa2_ref[...], a.astype(jnp.bfloat16),
                                     preferred_element_type=jnp.float32) + ba2_ref[...])

        for b in range(Bt):
            sl = slice(b * N, (b + 1) * N)
            out_b = h2[:, sl] * att[:, sl] + x_ref[b]             # identity shortcut
            o_ref[b] = jnp.maximum(out_b, 0.0).astype(o_ref.dtype)

    return kernel


def residual_block(x, params, *, eps=1e-5):
    """Inference-mode ResidualBlock forward, stride=1, in_channels == out_channels.

    x: (B, C, H, W) float32 (PyTorch NCHW).  params: PyTorch-layout tensors.
    """
    # TODO(synk): projection shortcut (stride != 1 or Cin != Cout: 1x1 conv + BN)
    # and training-mode BatchNorm (batch statistics) are not implemented here.
    B, C, H, W = x.shape
    N = H * W
    C8 = params["att_w1"].shape[0]
    Bt = _pick_bt(B, N)

    def fold_bn(w, gamma, beta, mean, var):
        scale = gamma / jnp.sqrt(var + eps)                       # (Cout,)
        wf = w * scale[:, None, None, None]                       # (Cout, Cin, 3, 3)
        # -> (Cout, 9*Cin), tap-major: column = (kh*3 + kw)*Cin + cin
        wf = jnp.transpose(wf, (0, 2, 3, 1)).reshape(C, 9 * C)
        bf = (beta - mean * scale)[:, None]                       # (Cout, 1)
        return wf.astype(jnp.bfloat16), bf.astype(jnp.float32)

    w1f, b1f = fold_bn(params["conv1_w"], params["bn1_g"], params["bn1_b"],
                       params["bn1_m"], params["bn1_v"])
    w2f, b2f = fold_bn(params["conv2_w"], params["bn2_g"], params["bn2_b"],
                       params["bn2_m"], params["bn2_v"])

    # 1x1 attention convs as (Cout, Cin) matrices; pad the C//8 bottleneck to a
    # multiple of 8 sublanes (zero rows/cols -> output unchanged).  Weights bf16.
    C8p = ((C8 + 7) // 8) * 8
    wa1p = jnp.zeros((C8p, C), jnp.float32).at[:C8].set(
        params["att_w1"][:, :, 0, 0]).astype(jnp.bfloat16)
    ba1p = jnp.zeros((C8p, 1), jnp.float32).at[:C8, 0].set(params["att_b1"])
    wa2p = jnp.zeros((C, C8p), jnp.float32).at[:, :C8].set(
        params["att_w2"][:, :, 0, 0]).astype(jnp.bfloat16)
    ba2 = params["att_b2"][:, None].astype(jnp.float32)

    # Compile-time zero-padding masks for the 9 taps (no iota/div/mod in-kernel).
    pix = np.arange(N)
    hh, ww = pix // W, pix % W
    masks = np.stack([((hh + dh >= 0) & (hh + dh < H) &
                       (ww + dw >= 0) & (ww + dw < W)).astype(np.float32)
                      for dh in (-1, 0, 1) for dw in (-1, 0, 1)])  # (9, N)
    masks = jnp.asarray(masks)

    x3 = x.reshape(B, C, N)                                       # free view, no transpose

    out3 = pl.pallas_call(
        _make_kernel(H, W, C, Bt),
        out_shape=jax.ShapeDtypeStruct((B, C, N), x.dtype),
        grid_spec=pltpu.PrefetchScalarGridSpec(
            num_scalar_prefetch=0,
            grid=(B // Bt,),                                      # >= 2 steps when B >= 2
            in_specs=[
                pl.BlockSpec((Bt, C, N), lambda i: (i, 0, 0)),    # x slab, lane-dense
                pl.BlockSpec((9, N), lambda i: (0, 0)),           # tap validity masks
                pl.BlockSpec((C, 9 * C), lambda i: (0, 0)),       # conv1+bn1 folded (bf16)
                pl.BlockSpec((C, 1), lambda i: (0, 0)),
                pl.BlockSpec((C, 9 * C), lambda i: (0, 0)),       # conv2+bn2 folded (bf16)
                pl.BlockSpec((C, 1), lambda i: (0, 0)),
                pl.BlockSpec((C8p, C), lambda i: (0, 0)),         # attention 1x1 convs
                pl.BlockSpec((C8p, 1), lambda i: (0, 0)),
                pl.BlockSpec((C, C8p), lambda i: (0, 0)),
                pl.BlockSpec((C, 1), lambda i: (0, 0)),
            ],
            out_specs=pl.BlockSpec((Bt, C, N), lambda i: (i, 0, 0)),
            scratch_shapes=[pltpu.VMEM((9 * C, Bt * N), jnp.bfloat16)],  # im2col slab
        ),
        compiler_params=pltpu.CompilerParams(
            dimension_semantics=("parallel",),
            vmem_limit_bytes=32 * 1024 * 1024,                    # safe on v5e/v6e/v7x; usage ~1-2 MiB
        ),
    )(x3, masks, w1f, b1f, w2f, b2f, wa1p, ba1p, wa2p, ba2)

    return out3.reshape(B, C, H, W)


def make_params(key, C):
    C8 = C // 8
    ks = jax.random.split(key, 14)
    n = lambda k, shape, s=0.1: jax.random.normal(k, shape, jnp.float32) * s
    return {
        "conv1_w": n(ks[0], (C, C, 3, 3)),
        "bn1_g": 1.0 + n(ks[1], (C,)),
        "bn1_b": n(ks[2], (C,)),
        "bn1_m": n(ks[3], (C,)),
        "bn1_v": jax.random.uniform(ks[4], (C,), jnp.float32, 0.5, 1.5),
        "conv2_w": n(ks[5], (C, C, 3, 3)),
        "bn2_g": 1.0 + n(ks[6], (C,)),
        "bn2_b": n(ks[7], (C,)),
        "bn2_m": n(ks[8], (C,)),
        "bn2_v": jax.random.uniform(ks[9], (C,), jnp.float32, 0.5, 1.5),
        "att_w1": n(ks[10], (C8, C, 1, 1), 0.2),
        "att_b1": n(ks[11], (C8,)),
        "att_w2": n(ks[12], (C, C8, 1, 1), 0.2),
        "att_b2": n(ks[13], (C,)),
    }


def reference(x, params, *, eps=1e-5):
    """Pure-JAX f32 mirror of the PyTorch ResidualBlock forward (eval-mode BN)."""
    dn = ("NCHW", "OIHW", "NCHW")
    hp = jax.lax.Precision.HIGHEST

    def bn(y, g, b, m, v):
        g, b, m, v = (t[None, :, None, None] for t in (g, b, m, v))
        return (y - m) / jnp.sqrt(v + eps) * g + b

    def conv(y, w, pad):
        return jax.lax.conv_general_dilated(y, w, (1, 1), pad,
                                            dimension_numbers=dn, precision=hp)

    out = jax.nn.relu(bn(conv(x, params["conv1_w"], ((1, 1), (1, 1))),
                         params["bn1_g"], params["bn1_b"],
                         params["bn1_m"], params["bn1_v"]))
    out = bn(conv(out, params["conv2_w"], ((1, 1), (1, 1))),
             params["bn2_g"], params["bn2_b"], params["bn2_m"], params["bn2_v"])
    att = out                                                     # avg_pool2d(out, 1) == out
    att = jax.nn.relu(conv(att, params["att_w1"], ((0, 0), (0, 0)))
                      + params["att_b1"][None, :, None, None])
    att = jax.nn.sigmoid(conv(att, params["att_w2"], ((0, 0), (0, 0)))
                         + params["att_b2"][None, :, None, None])
    out = out * att
    out = out + x                                                 # identity shortcut
    return jax.nn.relu(out)


def _check(out, ref, tag):
    max_err = float(jnp.max(jnp.abs(out - ref)))
    rel = float(jnp.linalg.norm(out - ref) / (jnp.linalg.norm(ref) + 1e-8))
    # bf16 MXU operands with f32 accumulation vs an all-f32 HIGHEST reference:
    # expect ~1e-2 relative error; a logic bug would be O(1).
    assert rel < 4e-2 and max_err < 0.5, f"{tag}: rel l2 {rel}, max abs {max_err}"


if __name__ == "__main__":
    key = jax.random.PRNGKey(0)
    kx, kp = jax.random.split(key)

    # channels must be >= 8 (attention bottleneck is C // 8)
    B, C, H, W = 2, 32, 16, 16
    x = jax.random.normal(kx, (B, C, H, W), dtype=jnp.float32)
    params = make_params(kp, C)

    out = jax.block_until_ready(residual_block(x, params))
    assert out.shape == (B, C, H, W)
    _check(out, reference(x, params), "B=2 (Bt=1)")

    # also exercise the multi-image-per-grid-step path (Bt > 1)
    x2 = jax.random.normal(jax.random.PRNGKey(1), (8, C, H, W), dtype=jnp.float32)
    out2 = jax.block_until_ready(residual_block(x2, params))
    _check(out2, reference(x2, params), "B=8 (Bt=4)")

    print("KERNEL_OK")
</pallas_src>

<mosaic_0001>
module attributes {stable_mosaic.version = 11 : i64} {
  func.func @kernel(%arg0: i32, %arg1: memref<1x32x256xf32, #tpu.memory_space<vmem>>, %arg2: memref<9x256xf32, #tpu.memory_space<vmem>>, %arg3: memref<32x288xbf16, #tpu.memory_space<vmem>>, %arg4: memref<32x1xf32, #tpu.memory_space<vmem>>, %arg5: memref<32x288xbf16, #tpu.memory_space<vmem>>, %arg6: memref<32x1xf32, #tpu.memory_space<vmem>>, %arg7: memref<8x32xbf16, #tpu.memory_space<vmem>>, %arg8: memref<8x1xf32, #tpu.memory_space<vmem>>, %arg9: memref<32x8xbf16, #tpu.memory_space<vmem>>, %arg10: memref<32x1xf32, #tpu.memory_space<vmem>>, %arg11: memref<1x32x256xf32, #tpu.memory_space<vmem>>, %arg12: memref<288x256xbf16, #tpu.memory_space<vmem>>) attributes {dimension_semantics = [#tpu.dimension_semantics<parallel>], iteration_bounds = array<i64: 2>, scalar_prefetch = 0 : i64, scratch_operands = 1 : i64, tpu.core_type = #tpu.core_type<tc>, window_params = [{transform_indices = @transform_0, window_bounds = array<i64: 1, 32, 256>}, {pipeline_mode = #tpu.pipeline_mode<synchronous>, transform_indices = @transform_1, window_bounds = array<i64: 9, 256>}, {pipeline_mode = #tpu.pipeline_mode<synchronous>, transform_indices = @transform_2, window_bounds = array<i64: 32, 288>}, {pipeline_mode = #tpu.pipeline_mode<synchronous>, transform_indices = @transform_3, window_bounds = array<i64: 32, 1>}, {pipeline_mode = #tpu.pipeline_mode<synchronous>, transform_indices = @transform_4, window_bounds = array<i64: 32, 288>}, {pipeline_mode = #tpu.pipeline_mode<synchronous>, transform_indices = @transform_5, window_bounds = array<i64: 32, 1>}, {pipeline_mode = #tpu.pipeline_mode<synchronous>, transform_indices = @transform_6, window_bounds = array<i64: 8, 32>}, {pipeline_mode = #tpu.pipeline_mode<synchronous>, transform_indices = @transform_7, window_bounds = array<i64: 8, 1>}, {pipeline_mode = #tpu.pipeline_mode<synchronous>, transform_indices = @transform_8, window_bounds = array<i64: 32, 8>}, {pipeline_mode = #tpu.pipeline_mode<synchronous>, transform_indices = @transform_9, window_bounds = array<i64: 32, 1>}, {transform_indices = @transform_10, window_bounds = array<i64: 1, 32, 256>}]} {
    %c0 = arith.constant 0 : index
    %c0_0 = arith.constant 0 : index
    %c0_1 = arith.constant 0 : index
    %0 = vector.load %arg1[%c0, %c0_0, %c0_1] : memref<1x32x256xf32, #tpu.memory_space<vmem>>, vector<1x32x256xf32>
    %1 = vector.shape_cast %0 : vector<1x32x256xf32> to vector<32x256xf32>
    %c17_i32 = arith.constant 17 : i32
    %2 = tpu.dynamic_rotate %1 by %c17_i32 dim 1 : vector<32x256xf32>, i32 -> vector<32x256xf32>
    %c0_2 = arith.constant 0 : index
    %c0_3 = arith.constant 0 : index
    %3 = vector.load %arg2[%c0_2, %c0_3] : memref<9x256xf32, #tpu.memory_space<vmem>>, vector<1x256xf32>
    %4 = vector.broadcast %3 : vector<1x256xf32> to vector<32x256xf32>
    %5 = arith.mulf %2, %4 : vector<32x256xf32>
    %6 = arith.truncf %5 : vector<32x256xf32> to vector<32x256xbf16>
    %c0_4 = arith.constant 0 : index
    %c0_5 = arith.constant 0 : index
    %7 = vector.load %arg12[%c0_4, %c0_5] : memref<288x256xbf16, #tpu.memory_space<vmem>>, vector<32x256xbf16>
    tpu.vector_store %arg12[%c0_4, %c0_5], %6 {strides = array<i32>} : memref<288x256xbf16, #tpu.memory_space<vmem>>, vector<32x256xbf16>,
    %c16_i32 = arith.constant 16 : i32
    %8 = tpu.dynamic_rotate %1 by %c16_i32 dim 1 : vector<32x256xf32>, i32 -> vector<32x256xf32>
    %c1 = arith.constant 1 : index
    %c0_6 = arith.constant 0 : index
    %9 = vector.load %arg2[%c1, %c0_6] : memref<9x256xf32, #tpu.memory_space<vmem>>, vector<1x256xf32>
    %10 = vector.broadcast %9 : vector<1x256xf32> to vector<32x256xf32>
    %11 = arith.mulf %8, %10 : vector<32x256xf32>
    %12 = arith.truncf %11 : vector<32x256xf32> to vector<32x256xbf16>
    %c32 = arith.constant 32 : index
    %c0_7 = arith.constant 0 : index
    %13 = vector.load %arg12[%c32, %c0_7] : memref<288x256xbf16, #tpu.memory_space<vmem>>, vector<32x256xbf16>
    tpu.vector_store %arg12[%c32, %c0_7], %12 {strides = array<i32>} : memref<288x256xbf16, #tpu.memory_space<vmem>>, vector<32x256xbf16>,
    %c15_i32 = arith.constant 15 : i32
    %14 = tpu.dynamic_rotate %1 by %c15_i32 dim 1 : vector<32x256xf32>, i32 -> vector<32x256xf32>
    %c2 = arith.constant 2 : index
    %c0_8 = arith.constant 0 : index
    %15 = vector.load %arg2[%c2, %c0_8] : memref<9x256xf32, #tpu.memory_space<vmem>>, vector<1x256xf32>
    %16 = vector.broadcast %15 : vector<1x256xf32> to vector<32x256xf32>
    %17 = arith.mulf %14, %16 : vector<32x256xf32>
    %18 = arith.truncf %17 : vector<32x256xf32> to vector<32x256xbf16>
    %c64 = arith.constant 64 : index
    %c0_9 = arith.constant 0 : index
    %19 = vector.load %arg12[%c64, %c0_9] : memref<288x256xbf16, #tpu.memory_space<vmem>>, vector<32x256xbf16>
    tpu.vector_store %arg12[%c64, %c0_9], %18 {strides = array<i32>} : memref<288x256xbf16, #tpu.memory_space<vmem>>, vector<32x256xbf16>,
    %c1_i32 = arith.constant 1 : i32
    %20 = tpu.dynamic_rotate %1 by %c1_i32 dim 1 : vector<32x256xf32>, i32 -> vector<32x256xf32>
    %c3 = arith.constant 3 : index
    %c0_10 = arith.constant 0 : index
    %21 = vector.load %arg2[%c3, %c0_10] : memref<9x256xf32, #tpu.memory_space<vmem>>, vector<1x256xf32>
    %22 = vector.broadcast %21 : vector<1x256xf32> to vector<32x256xf32>
    %23 = arith.mulf %20, %22 : vector<32x256xf32>
    %24 = arith.truncf %23 : vector<32x256xf32> to vector<32x256xbf16>
    %c96 = arith.constant 96 : index
    %c0_11 = arith.constant 0 : index
    %25 = vector.load %arg12[%c96, %c0_11] : memref<288x256xbf16, #tpu.memory_space<vmem>>, vector<32x256xbf16>
    tpu.vector_store %arg12[%c96, %c0_11], %24 {strides = array<i32>} : memref<288x256xbf16, #tpu.memory_space<vmem>>, vector<32x256xbf16>,
    %26 = arith.truncf %1 : vector<32x256xf32> to vector<32x256xbf16>
    %c128 = arith.constant 128 : index
    %c0_12 = arith.constant 0 : index
    %27 = vector.load %arg12[%c128, %c0_12] : memref<288x256xbf16, #tpu.memory_space<vmem>>, vector<32x256xbf16>
    tpu.vector_store %arg12[%c128, %c0_12], %26 {strides = array<i32>} : memref<288x256xbf16, #tpu.memory_space<vmem>>, vector<32x256xbf16>,
    %c255_i32 = arith.constant 255 : i32
    %28 = tpu.dynamic_rotate %1 by %c255_i32 dim 1 : vector<32x256xf32>, i32 -> vector<32x256xf32>
    %c5 = arith.constant 5 : index
    %c0_13 = arith.constant 0 : index
    %29 = vector.load %arg2[%c5, %c0_13] : memref<9x256xf32, #tpu.memory_space<vmem>>, vector<1x256xf32>
    %30 = vector.broadcast %29 : vector<1x256xf32> to vector<32x256xf32>
    %31 = arith.mulf %28, %30 : vector<32x256xf32>
    %32 = arith.truncf %31 : vector<32x256xf32> to vector<32x256xbf16>
    %c160 = arith.constant 160 : index
    %c0_14 = arith.constant 0 : index
    %33 = vector.load %arg12[%c160, %c0_14] : memref<288x256xbf16, #tpu.memory_space<vmem>>, vector<32x256xbf16>
    tpu.vector_store %arg12[%c160, %c0_14], %32 {strides = array<i32>} : memref<288x256xbf16, #tpu.memory_space<vmem>>, vector<32x256xbf16>,
    %c241_i32 = arith.constant 241 : i32
    %34 = tpu.dynamic_rotate %1 by %c241_i32 dim 1 : vector<32x256xf32>, i32 -> vector<32x256xf32>
    %c6 = arith.constant 6 : index
    %c0_15 = arith.constant 0 : index
    %35 = vector.load %arg2[%c6, %c0_15] : memref<9x256xf32, #tpu.memory_space<vmem>>, vector<1x256xf32>
    %36 = vector.broadcast %35 : vector<1x256xf32> to vector<32x256xf32>
    %37 = arith.mulf %34, %36 : vector<32x256xf32>
    %38 = arith.truncf %37 : vector<32x256xf32> to vector<32x256xbf16>
    %c192 = arith.constant 192 : index
    %c0_16 = arith.constant 0 : index
    %39 = vector.load %arg12[%c192, %c0_16] : memref<288x256xbf16, #tpu.memory_space<vmem>>, vector<32x256xbf16>
    tpu.vector_store %arg12[%c192, %c0_16], %38 {strides = array<i32>} : memref<288x256xbf16, #tpu.memory_space<vmem>>, vector<32x256xbf16>,
    %c240_i32 = arith.constant 240 : i32
    %40 = tpu.dynamic_rotate %1 by %c240_i32 dim 1 : vector<32x256xf32>, i32 -> vector<32x256xf32>
    %c7 = arith.constant 7 : index
    %c0_17 = arith.constant 0 : index
    %41 = vector.load %arg2[%c7, %c0_17] : memref<9x256xf32, #tpu.memory_space<vmem>>, vector<1x256xf32>
    %42 = vector.broadcast %41 : vector<1x256xf32> to vector<32x256xf32>
    %43 = arith.mulf %40, %42 : vector<32x256xf32>
    %44 = arith.truncf %43 : vector<32x256xf32> to vector<32x256xbf16>
    %c224 = arith.constant 224 : index
    %c0_18 = arith.constant 0 : index
    %45 = vector.load %arg12[%c224, %c0_18] : memref<288x256xbf16, #tpu.memory_space<vmem>>, vector<32x256xbf16>
    tpu.vector_store %arg12[%c224, %c0_18], %44 {strides = array<i32>} : memref<288x256xbf16, #tpu.memory_space<vmem>>, vector<32x256xbf16>,
    %c239_i32 = arith.constant 239 : i32
    %46 = tpu.dynamic_rotate %1 by %c239_i32 dim 1 : vector<32x256xf32>, i32 -> vector<32x256xf32>
    %c8 = arith.constant 8 : index
    %c0_19 = arith.constant 0 : index
    %47 = vector.load %arg2[%c8, %c0_19] : memref<9x256xf32, #tpu.memory_space<vmem>>, vector<1x256xf32>
    %48 = vector.broadcast %47 : vector<1x256xf32> to vector<32x256xf32>
    %49 = arith.mulf %46, %48 : vector<32x256xf32>
    %50 = arith.truncf %49 : vector<32x256xf32> to vector<32x256xbf16>
    %c256 = arith.constant 256 : index
    %c0_20 = arith.constant 0 : index
    %51 = vector.load %arg12[%c256, %c0_20] : memref<288x256xbf16, #tpu.memory_space<vmem>>, vector<32x256xbf16>
    tpu.vector_store %arg12[%c256, %c0_20], %50 {strides = array<i32>} : memref<288x256xbf16, #tpu.memory_space<vmem>>, vector<32x256xbf16>,
    %c0_21 = arith.constant 0 : index
    %c0_22 = arith.constant 0 : index
    %52 = vector.load %arg3[%c0_21, %c0_22] : memref<32x288xbf16, #tpu.memory_space<vmem>>, vector<32x288xbf16>
    %c0_23 = arith.constant 0 : index
    %c0_24 = arith.constant 0 : index
    %53 = vector.load %arg12[%c0_23, %c0_24] : memref<288x256xbf16, #tpu.memory_space<vmem>>, vector<288x256xbf16>
    %cst = arith.constant dense<0.000000e+00> : vector<32x256xf32>
    %54 = tpu.matmul %52, %53, %cst {dimension_numbers = #tpu.dot_dimension_numbers<[1], [0], [0], [1], [0, 0, 1, 1], [], []>} : vector<32x288xbf16>, vector<288x256xbf16>, vector<32x256xf32> -> vector<32x256xf32>
    %c0_25 = arith.constant 0 : index
    %c0_26 = arith.constant 0 : index
    %55 = vector.load %arg4[%c0_25, %c0_26] : memref<32x1xf32, #tpu.memory_space<vmem>>, vector<32x1xf32>
    %56 = vector.broadcast %55 : vector<32x1xf32> to vector<32x256xf32>
    %57 = arith.addf %54, %56 : vector<32x256xf32>
    %cst_27 = arith.constant 0.000000e+00 : f32
    %58 = vector.broadcast %cst_27 : f32 to vector<32x256xf32>
    %59 = arith.maximumf %57, %58 : vector<32x256xf32>
    %c17_i32_28 = arith.constant 17 : i32
    %60 = tpu.dynamic_rotate %59 by %c17_i32_28 dim 1 : vector<32x256xf32>, i32 -> vector<32x256xf32>
    %c0_29 = arith.constant 0 : index
    %c0_30 = arith.constant 0 : index
    %61 = vector.load %arg2[%c0_29, %c0_30] : memref<9x256xf32, #tpu.memory_space<vmem>>, vector<1x256xf32>
    %62 = vector.broadcast %61 : vector<1x256xf32> to vector<32x256xf32>
    %63 = arith.mulf %60, %62 : vector<32x256xf32>
    %64 = arith.truncf %63 : vector<32x256xf32> to vector<32x256xbf16>
    %c0_31 = arith.constant 0 : index
    %c0_32 = arith.constant 0 : index
    %65 = vector.load %arg12[%c0_31, %c0_32] : memref<288x256xbf16, #tpu.memory_space<vmem>>, vector<32x256xbf16>
    tpu.vector_store %arg12[%c0_31, %c0_32], %64 {strides = array<i32>} : memref<288x256xbf16, #tpu.memory_space<vmem>>, vector<32x256xbf16>,
    %c16_i32_33 = arith.constant 16 : i32
    %66 = tpu.dynamic_rotate %59 by %c16_i32_33 dim 1 : vector<32x256xf32>, i32 -> vector<32x256xf32>
    %c1_34 = arith.constant 1 : index
    %c0_35 = arith.constant 0 : index
    %67 = vector.load %arg2[%c1_34, %c0_35] : memref<9x256xf32, #tpu.memory_space<vmem>>, vector<1x256xf32>
    %68 = vector.broadcast %67 : vector<1x256xf32> to vector<32x256xf32>
    %69 = arith.mulf %66, %68 : vector<32x256xf32>
    %70 = arith.truncf %69 : vector<32x256xf32> to vector<32x256xbf16>
    %c32_36 = arith.constant 32 : index
    %c0_37 = arith.constant 0 : index
    %71 = vector.load %arg12[%c32_36, %c0_37] : memref<288x256xbf16, #tpu.memory_space<vmem>>, vector<32x256xbf16>
    tpu.vector_store %arg12[%c32_36, %c0_37], %70 {strides = array<i32>} : memref<288x256xbf16, #tpu.memory_space<vmem>>, vector<32x256xbf16>,
    %c15_i32_38 = arith.constant 15 : i32
    %72 = tpu.dynamic_rotate %59 by %c15_i32_38 dim 1 : vector<32x256xf32>, i32 -> vector<32x256xf32>
    %c2_39 = arith.constant 2 : index
    %c0_40 = arith.constant 0 : index
    %73 = vector.load %arg2[%c2_39, %c0_40] : memref<9x256xf32, #tpu.memory_space<vmem>>, vector<1x256xf32>
    %74 = vector.broadcast %73 : vector<1x256xf32> to vector<32x256xf32>
    %75 = arith.mulf %72, %74 : vector<32x256xf32>
    %76 = arith.truncf %75 : vector<32x256xf32> to vector<32x256xbf16>
    %c64_41 = arith.constant 64 : index
    %c0_42 = arith.constant 0 : index
    %77 = vector.load %arg12[%c64_41, %c0_42] : memref<288x256xbf16, #tpu.memory_space<vmem>>, vector<32x256xbf16>
    tpu.vector_store %arg12[%c64_41, %c0_42], %76 {strides = array<i32>} : memref<288x256xbf16, #tpu.memory_space<vmem>>, vector<32x256xbf16>,
    %c1_i32_43 = arith.constant 1 : i32
    %78 = tpu.dynamic_rotate %59 by %c1_i32_43 dim 1 : vector<32x256xf32>, i32 -> vector<32x256xf32>
    %c3_44 = arith.constant 3 : index
    %c0_45 = arith.constant 0 : index
    %79 = vector.load %arg2[%c3_44, %c0_45] : memref<9x256xf32, #tpu.memory_space<vmem>>, vector<1x256xf32>
    %80 = vector.broadcast %79 : vector<1x256xf32> to vector<32x256xf32>
    %81 = arith.mulf %78, %80 : vector<32x256xf32>
    %82 = arith.truncf %81 : vector<32x256xf32> to vector<32x256xbf16>
    %c96_46 = arith.constant 96 : index
    %c0_47 = arith.constant 0 : index
    %83 = vector.load %arg12[%c96_46, %c0_47] : memref<288x256xbf16, #tpu.memory_space<vmem>>, vector<32x256xbf16>
    tpu.vector_store %arg12[%c96_46, %c0_47], %82 {strides = array<i32>} : memref<288x256xbf16, #tpu.memory_space<vmem>>, vector<32x256xbf16>,
    %84 = arith.truncf %59 : vector<32x256xf32> to vector<32x256xbf16>
    %c128_48 = arith.constant 128 : index
    %c0_49 = arith.constant 0 : index
    %85 = vector.load %arg12[%c128_48, %c0_49] : memref<288x256xbf16, #tpu.memory_space<vmem>>, vector<32x256xbf16>
    tpu.vector_store %arg12[%c128_48, %c0_49], %84 {strides = array<i32>} : memref<288x256xbf16, #tpu.memory_space<vmem>>, vector<32x256xbf16>,
    %c255_i32_50 = arith.constant 255 : i32
    %86 = tpu.dynamic_rotate %59 by %c255_i32_50 dim 1 : vector<32x256xf32>, i32 -> vector<32x256xf32>
    %c5_51 = arith.constant 5 : index
    %c0_52 = arith.constant 0 : index
    %87 = vector.load %arg2[%c5_51, %c0_52] : memref<9x256xf32, #tpu.memory_space<vmem>>, vector<1x256xf32>
    %88 = vector.broadcast %87 : vector<1x256xf32> to vector<32x256xf32>
    %89 = arith.mulf %86, %88 : vector<32x256xf32>
    %90 = arith.truncf %89 : vector<32x256xf32> to vector<32x256xbf16>
    %c160_53 = arith.constant 160 : index
    %c0_54 = arith.constant 0 : index
    %91 = vector.load %arg12[%c160_53, %c0_54] : memref<288x256xbf16, #tpu.memory_space<vmem>>, vector<32x256xbf16>
    tpu.vector_store %arg12[%c160_53, %c0_54], %90 {strides = array<i32>} : memref<288x256xbf16, #tpu.memory_space<vmem>>, vector<32x256xbf16>,
    %c241_i32_55 = arith.constant 241 : i32
    %92 = tpu.dynamic_rotate %59 by %c241_i32_55 dim 1 : vector<32x256xf32>, i32 -> vector<32x256xf32>
    %c6_56 = arith.constant 6 : index
    %c0_57 = arith.constant 0 : index
    %93 = vector.load %arg2[%c6_56, %c0_57] : memref<9x256xf32, #tpu.memory_space<vmem>>, vector<1x256xf32>
    %94 = vector.broadcast %93 : vector<1x256xf32> to vector<32x256xf32>
    %95 = arith.mulf %92, %94 : vector<32x256xf32>
    %96 = arith.truncf %95 : vector<32x256xf32> to vector<32x256xbf16>
    %c192_58 = arith.constant 192 : index
    %c0_59 = arith.constant 0 : index
    %97 = vector.load %arg12[%c192_58, %c0_59] : memref<288x256xbf16, #tpu.memory_space<vmem>>, vector<32x256xbf16>
    tpu.vector_store %arg12[%c192_58, %c0_59], %96 {strides = array<i32>} : memref<288x256xbf16, #tpu.memory_space<vmem>>, vector<32x256xbf16>,
    %c240_i32_60 = arith.constant 240 : i32
    %98 = tpu.dynamic_rotate %59 by %c240_i32_60 dim 1 : vector<32x256xf32>, i32 -> vector<32x256xf32>
    %c7_61 = arith.constant 7 : index
    %c0_62 = arith.constant 0 : index
    %99 = vector.load %arg2[%c7_61, %c0_62] : memref<9x256xf32, #tpu.memory_space<vmem>>, vector<1x256xf32>
    %100 = vector.broadcast %99 : vector<1x256xf32> to vector<32x256xf32>
    %101 = arith.mulf %98, %100 : vector<32x256xf32>
    %102 = arith.truncf %101 : vector<32x256xf32> to vector<32x256xbf16>
    %c224_63 = arith.constant 224 : index
    %c0_64 = arith.constant 0 : index
    %103 = vector.load %arg12[%c224_63, %c0_64] : memref<288x256xbf16, #tpu.memory_space<vmem>>, vector<32x256xbf16>
    tpu.vector_store %arg12[%c224_63, %c0_64], %102 {strides = array<i32>} : memref<288x256xbf16, #tpu.memory_space<vmem>>, vector<32x256xbf16>,
    %c239_i32_65 = arith.constant 239 : i32
    %104 = tpu.dynamic_rotate %59 by %c239_i32_65 dim 1 : vector<32x256xf32>, i32 -> vector<32x256xf32>
    %c8_66 = arith.constant 8 : index
    %c0_67 = arith.constant 0 : index
    %105 = vector.load %arg2[%c8_66, %c0_67] : memref<9x256xf32, #tpu.memory_space<vmem>>, vector<1x256xf32>
    %106 = vector.broadcast %105 : vector<1x256xf32> to vector<32x256xf32>
    %107 = arith.mulf %104, %106 : vector<32x256xf32>
    %108 = arith.truncf %107 : vector<32x256xf32> to vector<32x256xbf16>
    %c256_68 = arith.constant 256 : index
    %c0_69 = arith.constant 0 : index
    %109 = vector.load %arg12[%c256_68, %c0_69] : memref<288x256xbf16, #tpu.memory_space<vmem>>, vector<32x256xbf16>
    tpu.vector_store %arg12[%c256_68, %c0_69], %108 {strides = array<i32>} : memref<288x256xbf16, #tpu.memory_space<vmem>>, vector<32x256xbf16>,
    %c0_70 = arith.constant 0 : index
    %c0_71 = arith.constant 0 : index
    %110 = vector.load %arg5[%c0_70, %c0_71] : memref<32x288xbf16, #tpu.memory_space<vmem>>, vector<32x288xbf16>
    %c0_72 = arith.constant 0 : index
    %c0_73 = arith.constant 0 : index
    %111 = vector.load %arg12[%c0_72, %c0_73] : memref<288x256xbf16, #tpu.memory_space<vmem>>, vector<288x256xbf16>
    %cst_74 = arith.constant dense<0.000000e+00> : vector<32x256xf32>
    %112 = tpu.matmul %110, %111, %cst_74 {dimension_numbers = #tpu.dot_dimension_numbers<[1], [0], [0], [1], [0, 0, 1, 1], [], []>} : vector<32x288xbf16>, vector<288x256xbf16>, vector<32x256xf32> -> vector<32x256xf32>
    %c0_75 = arith.constant 0 : index
    %c0_76 = arith.constant 0 : index
    %113 = vector.load %arg6[%c0_75, %c0_76] : memref<32x1xf32, #tpu.memory_space<vmem>>, vector<32x1xf32>
    %114 = vector.broadcast %113 : vector<32x1xf32> to vector<32x256xf32>
    %115 = arith.addf %112, %114 : vector<32x256xf32>
    %c0_77 = arith.constant 0 : index
    %c0_78 = arith.constant 0 : index
    %116 = vector.load %arg7[%c0_77, %c0_78] : memref<8x32xbf16, #tpu.memory_space<vmem>>, vector<8x32xbf16>
    %117 = arith.truncf %115 : vector<32x256xf32> to vector<32x256xbf16>
    %cst_79 = arith.constant dense<0.000000e+00> : vector<8x256xf32>
    %118 = tpu.matmul %116, %117, %cst_79 {dimension_numbers = #tpu.dot_dimension_numbers<[1], [0], [0], [1], [0, 0, 1, 1], [], []>} : vector<8x32xbf16>, vector<32x256xbf16>, vector<8x256xf32> -> vector<8x256xf32>
    %c0_80 = arith.constant 0 : index
    %c0_81 = arith.constant 0 : index
    %119 = vector.load %arg8[%c0_80, %c0_81] : memref<8x1xf32, #tpu.memory_space<vmem>>, vector<8x1xf32>
    %120 = vector.broadcast %119 : vector<8x1xf32> to vector<8x256xf32>
    %121 = arith.addf %118, %120 : vector<8x256xf32>
    %cst_82 = arith.constant 0.000000e+00 : f32
    %122 = vector.broadcast %cst_82 : f32 to vector<8x256xf32>
    %123 = arith.maximumf %121, %122 : vector<8x256xf32>
    %c0_83 = arith.constant 0 : index
    %c0_84 = arith.constant 0 : index
    %124 = vector.load %arg9[%c0_83, %c0_84] : memref<32x8xbf16, #tpu.memory_space<vmem>>, vector<32x8xbf16>
    %125 = arith.truncf %123 : vector<8x256xf32> to vector<8x256xbf16>
    %cst_85 = arith.constant dense<0.000000e+00> : vector<32x256xf32>
    %126 = tpu.matmul %124, %125, %cst_85 {dimension_numbers = #tpu.dot_dimension_numbers<[1], [0], [0], [1], [0, 0, 1, 1], [], []>} : vector<32x8xbf16>, vector<8x256xbf16>, vector<32x256xf32> -> vector<32x256xf32>
    %c0_86 = arith.constant 0 : index
    %c0_87 = arith.constant 0 : index
    %127 = vector.load %arg10[%c0_86, %c0_87] : memref<32x1xf32, #tpu.memory_space<vmem>>, vector<32x1xf32>
    %128 = vector.broadcast %127 : vector<32x1xf32> to vector<32x256xf32>
    %129 = arith.addf %126, %128 : vector<32x256xf32>
    %130 = arith.negf %129 : vector<32x256xf32>
    %131 = math.exp %130 : vector<32x256xf32>
    %cst_88 = arith.constant 1.000000e+00 : f32
    %132 = vector.broadcast %cst_88 : f32 to vector<32x256xf32>
    %133 = arith.addf %132, %131 : vector<32x256xf32>
    %134 = arith.divf %132, %133 : vector<32x256xf32>
    %135 = arith.mulf %115, %134 : vector<32x256xf32>
    %c0_89 = arith.constant 0 : index
    %c0_90 = arith.constant 0 : index
    %c0_91 = arith.constant 0 : index
    %136 = vector.load %arg1[%c0_89, %c0_90, %c0_91] : memref<1x32x256xf32, #tpu.memory_space<vmem>>, vector<1x32x256xf32>
    %137 = vector.shape_cast %136 : vector<1x32x256xf32> to vector<32x256xf32>
    %138 = arith.addf %135, %137 : vector<32x256xf32>
    %cst_92 = arith.constant 0.000000e+00 : f32
    %139 = vector.broadcast %cst_92 : f32 to vector<32x256xf32>
    %140 = arith.maximumf %138, %139 : vector<32x256xf32>
    %c0_93 = arith.constant 0 : index
    %c0_94 = arith.constant 0 : index
    %c0_95 = arith.constant 0 : index
    %141 = vector.load %arg11[%c0_93, %c0_94, %c0_95] : memref<1x32x256xf32, #tpu.memory_space<vmem>>, vector<1x32x256xf32>
    %142 = vector.shape_cast %141 : vector<1x32x256xf32> to vector<32x256xf32>
    %143 = vector.shape_cast %140 : vector<32x256xf32> to vector<1x32x256xf32>
    tpu.vector_store %arg11[%c0_93, %c0_94, %c0_95], %143 {strides = array<i32>} : memref<1x32x256xf32, #tpu.memory_space<vmem>>, vector<1x32x256xf32>,
    return
  }
  func.func @transform_0(%arg0: i32) -> (i32, i32, i32) {
    %c0_i32 = arith.constant 0 : i32
    %c0_i32_0 = arith.constant 0 : i32
    %c0_i32_1 = arith.constant 0 : i32
    return %arg0, %c0_i32, %c0_i32_0 : i32, i32, i32
  }
  func.func @transform_1(%arg0: i32) -> (i32, i32) {
    %c0_i32 = arith.constant 0 : i32
    %c0_i32_0 = arith.constant 0 : i32
    %c0_i32_1 = arith.constant 0 : i32
    return %c0_i32, %c0_i32_0 : i32, i32
  }
  func.func @transform_2(%arg0: i32) -> (i32, i32) {
    %c0_i32 = arith.constant 0 : i32
    %c0_i32_0 = arith.constant 0 : i32
    %c0_i32_1 = arith.constant 0 : i32
    return %c0_i32, %c0_i32_0 : i32, i32
  }
  func.func @transform_3(%arg0: i32) -> (i32, i32) {
    %c0_i32 = arith.constant 0 : i32
    %c0_i32_0 = arith.constant 0 : i32
    %c0_i32_1 = arith.constant 0 : i32
    return %c0_i32, %c0_i32_0 : i32, i32
  }
  func.func @transform_4(%arg0: i32) -> (i32, i32) {
    %c0_i32 = arith.constant 0 : i32
    %c0_i32_0 = arith.constant 0 : i32
    %c0_i32_1 = arith.constant 0 : i32
    return %c0_i32, %c0_i32_0 : i32, i32
  }
  func.func @transform_5(%arg0: i32) -> (i32, i32) {
    %c0_i32 = arith.constant 0 : i32
    %c0_i32_0 = arith.constant 0 : i32
    %c0_i32_1 = arith.constant 0 : i32
    return %c0_i32, %c0_i32_0 : i32, i32
  }
  func.func @transform_6(%arg0: i32) -> (i32, i32) {
    %c0_i32 = arith.constant 0 : i32
    %c0_i32_0 = arith.constant 0 : i32
    %c0_i32_1 = arith.constant 0 : i32
    return %c0_i32, %c0_i32_0 : i32, i32
  }
  func.func @transform_7(%arg0: i32) -> (i32, i32) {
    %c0_i32 = arith.constant 0 : i32
    %c0_i32_0 = arith.constant 0 : i32
    %c0_i32_1 = arith.constant 0 : i32
    return %c0_i32, %c0_i32_0 : i32, i32
  }
  func.func @transform_8(%arg0: i32) -> (i32, i32) {
    %c0_i32 = arith.constant 0 : i32
    %c0_i32_0 = arith.constant 0 : i32
    %c0_i32_1 = arith.constant 0 : i32
    return %c0_i32, %c0_i32_0 : i32, i32
  }
  func.func @transform_9(%arg0: i32) -> (i32, i32) {
    %c0_i32 = arith.constant 0 : i32
    %c0_i32_0 = arith.constant 0 : i32
    %c0_i32_1 = arith.constant 0 : i32
    return %c0_i32, %c0_i32_0 : i32, i32
  }
  func.func @transform_10(%arg0: i32) -> (i32, i32, i32) {
    %c0_i32 = arith.constant 0 : i32
    %c0_i32_0 = arith.constant 0 : i32
    %c0_i32_1 = arith.constant 0 : i32
    return %arg0, %c0_i32, %c0_i32_0 : i32, i32, i32
  }
}

</mosaic_0001>

<bundles_post_ra>
// kernel: tpu_custom_call.1
= control target key start
LH: loop header
LB: loop body
LE: loop exit
PB: predicated region body
PF: predicated region fallthrough
CT: control target
= control target key end

     0   :  { %s4399_s0 = inlined_call_operand.hbm [shape: f32[2,32,256], index: 0, kind: input, shape index: {}]   ;;  %s4400_s1 = inlined_call_operand.hbm [shape: f32[9,256], index: 1, kind: input, shape index: {}]   ;;  %s4401_s2 = inlined_call_operand.vmem [shape: bf16[32,288], index: 2, kind: input, shape index: {}]   ;;  %s4402_s3 = inlined_call_operand.vmem [shape: f32[32,1], index: 3, kind: input, shape index: {}]   ;;  %s4403_s4 = inlined_call_operand.vmem [shape: bf16[32,288], index: 4, kind: input, shape index: {}]   ;;  %s4404_s5 = inlined_call_operand.vmem [shape: f32[32,1], index: 5, kind: input, shape index: {}]   ;;  %s4405_s6 = inlined_call_operand.vmem [shape: bf16[8,32], index: 6, kind: input, shape index: {}]   ;;  %s4406_s7 = inlined_call_operand.vmem [shape: f32[8,1], index: 7, kind: input, shape index: {}]   ;;  %s4407_s8 = inlined_call_operand.vmem [shape: bf16[32,8], index: 8, kind: input, shape index: {}]   ;;  %s4408_s9 = inlined_call_operand.vmem [shape: f32[32,1], index: 9, kind: input, shape index: {}]   ;;  %s4409_s10 = inlined_call_operand.hbm [shape: f32[2,32,256], index: 10, kind: output, shape index: {}]  }
   0x1   :  { %4421 = sst [smem:[#allocation15_spill]] %s4400_s1 }
   0x2   :  { %15 = vsyncpa [#allocation4], 0 }
   0x3   :  { %17 = vsyncpa [#allocation4 + $0x1], 0 }
   0x4   :  { %18 = vsyncpa [#allocation7], 0 }
   0x5   :  { %19 = vsyncpa [#allocation5], 0 }
   0x6   :  { %21 = vsyncpa [#allocation5 + $0x1], 0  ;;  %s3195_s13 = smov 0   ;;  %s3197_s14 = smov 0  }
   0x7   :  { %s3199_s15 = smov 0   ;;  %s3201_s16 = smov 0  }
   0x8 LB: > { %4422 = sst [smem:[#allocation12_spill]] %s3121_s15  ;;  %s3216_s17 = sadd.s32 4294967295, %s3125_s16   ;;  %s3125_s16 = sphi %s3201_s16, %s4447_s16   ;;  %s3121_s15 = sphi %s3199_s15, %s4444_s15   ;;  %s3117_s14 = sphi %s3197_s14, %s4446_s14   ;;  %s3113_s13 = sphi %s3195_s13, %s4445_s13  }
   0x9   : > { %s2405_s18 = sadd.s32 4294967294, %s3125_s16   ;;  %p47_p0 = scmp.ne.s32.totalorder %s3117_s14, %s3113_s13 }
   0xa   : > { %p48_p1 = scmp.eq.s32.totalorder %s3216_s17, 0  ;;  %p260_p2 = scmp.eq.s32.totalorder %s3216_s17, 1 }
   0xb   : > { %p266_p3 = scmp.eq.s32.totalorder %s2405_s18, 1  ;;  %p2406_p5 = scmp.ge.s32.totalorder %s3125_s16, 1 }
   0xc   : > { %p3225_p4 = por %p48_p1, %p47_p0  ;;  %p273_p7 = scmp.lt.s32.totalorder %s3125_s16, 3 }
   0xd   : > { %p3230_p6 = por %p266_p3, %p47_p0  ;;  %s4426_s1 = sld [smem:[#allocation15_spill]] }
   0xe   : > { %p3238_p8 = pnand %p2406_p5, %p273_p7  ;;  %s3127_s25 = smov [#allocation6]  }
   0xf   : > { %s4424_s20 = scalar_select %p3230_p6, 1, 0 }
  0x10   : > { %p2899_p9 = pneg %p3238_p8  ;;  %s286_s26 = sshll.u32 %s3127_s25, 4  ;;  %s287_s26 = int_to_ptr.vmem [resolvable:$true] %s286_s26 }
  0x11   : > { %4425 = sst [smem:[#allocation13_spill]] %s4424_s20  ;;  %s3248_s27 = sadd.s32 1, %s3125_s16  }
  0x12   : > { %p2900_p10 = pnand %p2899_p9, %p48_p1  ;;  %s4411_s28 = smov 256  }
  0x13   : > { %s284_s23 = sshll.u32 %s4426_s1, 4  ;;  %s4412_s29 = smov 16   ;;  %s285_s23 = int_to_ptr.hbm [resolvable:$true] %s284_s23 }
  0x14   : > { %2902 = dma.hbm_to_vmem [thread:$0]  (!%p2900_p10), %s285_s23, 512, %s287_s26, [#allocation7], %s4411_s28, %s4411_s28, %s4412_s29  }
  0x15   : > { %s31_s30 = ssub.s32 %s3125_s16, %s3248_s27  ;;  %s34_s11 = sadd.s32 1, %s3121_s15 }
  0x16   : > { %p32_p12 = scmp.eq.s32.totalorder %s31_s30, 0  ;;  %p41_p13 = scmp.ne.s32.totalorder %s3121_s15, %s3117_s14 }
  0x17   : > { %p42_p0 = scmp.eq.s32.totalorder %s3125_s16, 0  ;;  %p2912_p5 = scmp.lt.s32.totalorder %s3125_s16, 2 }
  0x18   : > { %s3260_s12 = scalar_select %p32_p12, %s3121_s15, %s34_s11  }
  0x19   : > { %p3264_p3 = por %p260_p2, %p41_p13  ;;  %s324_s21 = sand.u32 1, %s3121_s15  }
  0x1a   : > { %4428 = sst [smem:[#allocation14_spill]] %s3260_s12  ;;  %s2787_s22 = sshll.u32 %s3125_s16, 6 }
  0x1b   : > { %p43_p7 = por %p42_p0, %p41_p13  ;;  %s2409_s25 = sshll.u32 %s324_s21, 6 }
  0x1c   : > { %s333_s23 = scalar_lea.hbm %s4399_s0, %s2787_s22  ;;  %s328_s30 = scalar_lea.vmem [#allocation3], %s2409_s25 }
  0x1d   : > { %s334_s26 = sshll.u32 %s333_s23, 4  ;;  %s336_s28 = sshll.u32 %s328_s30, 4  ;;  %s335_s26 = int_to_ptr.hbm [resolvable:$true] %s334_s26  ;;  %s337_s28 = int_to_ptr.vmem [resolvable:$true] %s336_s28 }
  0x1e   : > { %p3274_p9 = pnand %p2912_p5, %p43_p7  ;;  %s325_s29 = scalar_lea.sflag [#allocation4], %s324_s21 }
  0x1f   : > { %s3025_s12 = sshra.s32 %s335_s26, 4  ;;  %s3032_s22 = scalar_lea.hbm %s4399_s0, 128  ;;  %s3026_s12 = int_to_ptr.hbm [resolvable:$true] %s3025_s12 }
  0x20   : > { %s3027_s15 = scalar_lea.hbm %s3026_s12, 64  ;;  %p3029_p10 = pneg %p3274_p9 }
  0x21   : > { %p3028_p2 = scmp.ne.s32.totalorder %s3026_s12, %s3027_s15  ;;  %p3033_p0 = scmp.lt.s32.totalorder %s3026_s12, %s4399_s0 }
  0x22   : > { %p3034_p5 = scmp.lt.s32.totalorder %s3032_s22, %s3027_s15 }
  0x23   : > { %p3030_p12 = pnand %p3029_p10, %p3028_p2 }
  0x24   : > { %p3035_p7 = por %p3034_p5, %p3033_p0 }
  0x25   : > { %p3031_p13 = pneg %p3030_p12 }
  0x27   : > { %p3036_p11 = pnand %p3035_p7, %p3031_p13 }
  0x29   : > { %3039 = shalt.err (!%p3036_p11)
}
  0x2a   : > { %s4431_s21 = smov 16   ;;  %s4432_s30 = smov 256  }
  0x2b   : > { %2906 = dma.hbm_to_vmem [thread:$0]  (!%p3274_p9), %s335_s26, 1024, %s337_s28, %s325_s29, %s4432_s30, %s4432_s30, %s4431_s21  }
  0x2c   : > { %348 = sbr.rel (%p3238_p8) target bundleno = 1306 (0x51a), region = 60  ;;  %s3294_s1 = sand.u32 (!%p3238_p8), 1, %s3117_s14  }
  0x2d   : > { %s4414_s15 = sshll.u32 (!%p3238_p8), %s3294_s1, 6  ;;  %s351_s12 = scalar_lea.sflag (!%p3238_p8), [#allocation4], %s3294_s1 }
  0x2e   : > { %s3300_s20 = scalar_lea.vmem (!%p3238_p8), [#allocation3], %s4414_s15 }
  0x31   : > { %3100 = dma.done.wait (%p3225_p4), %s351_s12, 1024  }
  0x32   : > { %3102 = vsyncadd (%p3225_p4), %s351_s12, 4294966272 }
  0x33   : > { %3104 = dma.done.wait (%p48_p1), [#allocation7], 512  }
  0x34   : > { %3106 = vsyncadd (%p48_p1), [#allocation7], 4294966784  ;;  %v3311_v0 = vld [vmem:[%s3300_s20 + $0x28] sm:$0xff]  ;;  %v3314_v1 = vld [vmem:[%s3300_s20 + $0x20] sm:$0xff]  ;;  %s4419_s19 = smov 1   ;;  %s3131_s24 = smov 15   ;;  %v422_v10 = vlaneseq }
  0x35   : > { %563 = vrot.lane.b32.xlu1 %v3311_v0, %s4419_s19  ;;  %555 = vrot.lane.b32.xlu0 %v3314_v1, %s4419_s19  ;;  %v3321_v2 = vld [vmem:[%s3300_s20] sm:$0xff]  ;;  %v3326_v3 = vld [vmem:[%s3300_s20 + $0x38] sm:$0xff]  ;;  %s3132_s28 = smov 16   ;;  %s4417_s29 = smov 111   ;;  %vm1077_vm7 = vcmask 261120   ;;  %vm2069_vm9 = vcmask 1043456  }
  0x36   : > { %551 = vrot.lane.b32.xlu2 %v3321_v2, %s4419_s19  ;;  %v3329_v4 = vld [vmem:[%s3300_s20 + $0x30] sm:$0xff]  ;;  %v3341_v6 = vld [vmem:[%s3300_s20 + $0x18] sm:$0xff]  ;;  %v3344_v7 = vld [vmem:[%s3300_s20 + $0x8] sm:$0xff]  ;;  %s4415_s26 = smov 17   ;;  %s3135_s11 = smov 112   ;;  %v3418_v11 = vand.u32 127, %v422_v10 }
  0x37   : > { %v3332_v5 = vld [vmem:[%s3300_s20 + $0x10] sm:$0xff]  ;;  %v577_v13 = vld [vmem:[#allocation6 + $0x3] ss:$8 sm:$0x3]  ;;  %s3136_s22 = smov 113   ;;  %s3137_s25 = smov 127  }
  0x38   : > { %vm567_vm0 = vcmp.lt.s32.totalorder %v3418_v11, 1  ;;  %v579_v14 = vperm.slane %v577_v13, 0  ;;  %v580_v15 = vperm.slane %v577_v13, 1  ;;  %v529_v43 = vld [vmem:[#allocation6 + $0x2] ss:$8 sm:$0x3] }
  0x39   : > { %vm519_vm1 = vcmp.lt.s32.totalorder %v3418_v11, 15  ;;  %v531_v52 = vperm.slane %v529_v43, 0  ;;  %v532_v53 = vperm.slane %v529_v43, 1  ;;  %vm471_vm2 = vcmp.lt.s32.totalorder %v3418_v11, 16  ;;  %s4434_s12 = smov 111   ;;  %s2307_s21 = scalar_lea.sflag [#allocation5], %s3294_s1 }
  0x3a   : > { %vm767_vm3 = vcmp.lt.s32.totalorder %v3418_v11, 111  ;;  %vm424_vm4 = vcmp.lt.s32.totalorder %v3418_v11, 17  ;;  %vm719_vm5 = vcmp.lt.s32.totalorder %v3418_v11, 112  ;;  %vm671_vm6 = vcmp.lt.s32.totalorder %v3418_v11, 113 }
  0x3b   : > { %vm623_vm8 = vcmp.lt.s32.totalorder %v3418_v11, 127  ;;  %vm2062_vm10 = vcmask 64512  }
  0x3d   : > { %565 = vrot.lane.b32.xlu1 %v3326_v3, %s4419_s19  ;;  %557 = vrot.lane.b32.xlu0 %v3329_v4, %s4419_s19 }
  0x3e   : > { %553 = vrot.lane.b32.xlu2 %v3332_v5, %s4419_s19 }
  0x45   : > { %561 = vrot.lane.b32.xlu1 %v3341_v6, %s4419_s19  ;;  %559 = vrot.lane.b32.xlu0 %v3344_v7, %s4419_s19  ;;  %s4433_s19 = smov 1  }
  0x46   : > { %507 = vrot.lane.b32.xlu2 %v3314_v1, %s3131_s24 }
  0x4d   : > { %515 = vrot.lane.b32.xlu1 %v3311_v0, %s3131_s24  ;;  %509 = vrot.lane.b32.xlu0 %v3329_v4, %s3131_s24 }
  0x4e   : > { %517 = vrot.lane.b32.xlu2 %v3326_v3, %s3131_s24 }
  0x55   : > { %505 = vrot.lane.b32.xlu1 %v3332_v5, %s3131_s24  ;;  %503 = vrot.lane.b32.xlu0 %v3321_v2, %s3131_s24 }
  0x56   : > { %511 = vrot.lane.b32.xlu2 %v3344_v7, %s3131_s24 }
  0x5d   : > { %459 = vrot.lane.b32.xlu1 %v3314_v1, %s3132_s28  ;;  %513 = vrot.lane.b32.xlu0 %v3341_v6, %s3131_s24 }
  0x5e   : > { %461 = vrot.lane.b32.xlu2 %v3329_v4, %s3132_s28 }
  0x65   : > { %469 = vrot.lane.b32.xlu1 %v3326_v3, %s3132_s28  ;;  %467 = vrot.lane.b32.xlu0 %v3311_v0, %s3132_s28 }
  0x66   : > { %755 = vrot.lane.b32.xlu2 %v3314_v1, %s4417_s29 }
  0x6d   : > { %763 = vrot.lane.b32.xlu1 %v3311_v0, %s4417_s29  ;;  %757 = vrot.lane.b32.xlu0 %v3329_v4, %s4417_s29 }
  0x6e   : > { %765 = vrot.lane.b32.xlu2 %v3326_v3, %s4417_s29 }
  0x75   : > { %457 = vrot.lane.b32.xlu1 %v3332_v5, %s3132_s28  ;;  %455 = vrot.lane.b32.xlu0 %v3321_v2, %s3132_s28 }
  0x76   : > { %463 = vrot.lane.b32.xlu2 %v3344_v7, %s3132_s28 }
  0x7d   : > { %751 = vrot.lane.b32.xlu1 %v3321_v2, %s4417_s29  ;;  %465 = vrot.lane.b32.xlu0 %v3341_v6, %s3132_s28 }
  0x7e   : > { %753 = vrot.lane.b32.xlu2 %v3332_v5, %s4417_s29 }
  0x85   : > { %761 = vrot.lane.b32.xlu1 %v3341_v6, %s4417_s29  ;;  %759 = vrot.lane.b32.xlu0 %v3344_v7, %s4417_s29 }
  0x86   : > { %410 = vrot.lane.b32.xlu2 %v3314_v1, %s4415_s26 }
  0x8d   : > { %418 = vrot.lane.b32.xlu1 %v3311_v0, %s4415_s26  ;;  %412 = vrot.lane.b32.xlu0 %v3329_v4, %s4415_s26 }
  0x8e   : > { %420 = vrot.lane.b32.xlu2 %v3326_v3, %s4415_s26 }
  0x90   : > { %v552_v8 = vpop.permute.xlu2 %551 }
  0x95   : > { %709 = vrot.lane.b32.xlu1 %v3329_v4, %s3135_s11  ;;  %707 = vrot.lane.b32.xlu0 %v3314_v1, %s3135_s11 }
  0x96   : > { %715 = vrot.lane.b32.xlu2 %v3311_v0, %s3135_s11 }
  0x98   : > { %v554_v9 = vpop.permute.xlu2 %553 }
  0x9d   : > { %406 = vrot.lane.b32.xlu1 %v3321_v2, %s4415_s26  ;;  %717 = vrot.lane.b32.xlu0 %v3326_v3, %s3135_s11 }
  0x9e   : > { %408 = vrot.lane.b32.xlu2 %v3332_v5, %s4415_s26 }
  0xa0   : > { %v3420_v12 = vpop.permute.xlu2 %507 }
  0xa5   : > { %416 = vrot.lane.b32.xlu1 %v3341_v6, %s4415_s26  ;;  %414 = vrot.lane.b32.xlu0 %v3344_v7, %s4415_s26 }
  0xa6   : > { %703 = vrot.lane.b32.xlu2 %v3321_v2, %s3135_s11 }
  0xa7   : > { %v564_v16 = vpop.permute.xlu1 %563  ;;  %v556_v17 = vpop.permute.xlu0 %555 }
  0xa8   : > { %v570_v18 = vsel %vm567_vm0, %v556_v17, %v564_v16  ;;  %v574_v19 = vsel %vm567_vm0, %v564_v16, %v556_v17  ;;  %v518_v22 = vpop.permute.xlu2 %517 }
  0xa9   : > { %v587_v20 = vmul.f32 %v579_v14, %v574_v19  ;;  %v588_v21 = vmul.f32 %v580_v15, %v570_v18 }
  0xab   : > { %v593_v23 = vpack.c.bf16 %v588_v21, %v587_v20 }
  0xad   : > { %597 = vst [vmem:[#allocation2 + $0x70] sm:$0xff] %v593_v23  ;;  %711 = vrot.lane.b32.xlu1 %v3344_v7, %s3135_s11  ;;  %705 = vrot.lane.b32.xlu0 %v3332_v5, %s3135_s11 }
  0xae   : > { %713 = vrot.lane.b32.xlu2 %v3341_v6, %s3135_s11 }
  0xaf   : > { %v566_v24 = vpop.permute.xlu1 %565  ;;  %v558_v25 = vpop.permute.xlu0 %557 }
  0xb0   : > { %v571_v26 = vsel %vm567_vm0, %v558_v25, %v566_v24  ;;  %v575_v27 = vsel %vm567_vm0, %v566_v24, %v558_v25  ;;  %v3443_v30 = vpop.permute.xlu2 %511 }
  0xb1   : > { %v589_v28 = vmul.f32 %v579_v14, %v575_v27  ;;  %v590_v29 = vmul.f32 %v580_v15, %v571_v26 }
  0xb3   : > { %v594_v31 = vpack.c.bf16 %v590_v29, %v589_v28 }
  0xb4   : > { %v2498_v46 = vld [vmem:[#allocation2 + $0x70] sm:$0xf]  ;;  %v2808_v48 = vld [vmem:[#allocation2 + $0x74] sm:$0xf] }
  0xb5   : > { %598 = vst [vmem:[#allocation2 + $0x78] sm:$0xff] %v594_v31  ;;  %661 = vrot.lane.b32.xlu1 %v3329_v4, %s3136_s22  ;;  %659 = vrot.lane.b32.xlu0 %v3314_v1, %s3136_s22 }
  0xb6   : > { %667 = vrot.lane.b32.xlu2 %v3311_v0, %s3136_s22 }
  0xb7   : > { %v562_v32 = vpop.permute.xlu1 %561  ;;  %v560_v33 = vpop.permute.xlu0 %559 }
  0xb8   : > { %v569_v34 = vsel %vm567_vm0, %v554_v9, %v562_v32  ;;  %v573_v35 = vsel %vm567_vm0, %v562_v32, %v554_v9  ;;  %v568_v36 = vsel %vm567_vm0, %v552_v8, %v560_v33  ;;  %v572_v37 = vsel %vm567_vm0, %v560_v33, %v552_v8  ;;  %v3459_v42 = vpop.permute.xlu2 %461 }
  0xb9   : > { %v585_v38 = vmul.f32 %v579_v14, %v573_v35  ;;  %v586_v39 = vmul.f32 %v580_v15, %v569_v34  ;;  %v583_v40 = vmul.f32 %v579_v14, %v572_v37  ;;  %v584_v41 = vmul.f32 %v580_v15, %v568_v36 }
  0xbb   : > { %v592_v44 = vpack.c.bf16 %v586_v39, %v585_v38  ;;  %v591_v45 = vpack.c.bf16 %v584_v41, %v583_v40  ;;  %v481_v39 = vld [vmem:[#allocation6 + $0x1] ss:$8 sm:$0x3] }
  0xbc   : > { %v2809_v47 = vld [vmem:[#allocation2 + $0x74] sm:$0xf0]  ;;  %v2500_v49 = vld [vmem:[#allocation2 + $0x78] sm:$0xf0]  ;;  %v3509_v41 = vperm.slane %v481_v39, 0  ;;  %v3511_v43 = vperm.slane %v481_v39, 1 }
  0xbd   : > { %596 = vst [vmem:[#allocation2 + $0x68] sm:$0xff] %v592_v44  ;;  %655 = vrot.lane.b32.xlu1 %v3321_v2, %s3136_s22  ;;  %669 = vrot.lane.b32.xlu0 %v3326_v3, %s3136_s22  ;;  %v2499_v50 = vor.u32 %v2809_v47, %v2498_v46  ;;  %v2503_v51 = vor.u32 %v2808_v48, %v2500_v49 }
  0xbe   : > { %595 = vst [vmem:[#allocation2 + $0x60] sm:$0xff] %v591_v45  ;;  %657 = vrot.lane.b32.xlu2 %v3332_v5, %s3136_s22 }
  0xbf   : > { %1084 = vmatpush.bf16.msra.mxu0 %v2499_v50  ;;  %1141 = vmatpush.bf16.msra.mxu3 %v2503_v51  ;;  %v516_v54 = vpop.permute.xlu1 %515  ;;  %v510_v55 = vpop.permute.xlu0 %509 }
  0xc0   : > { %v522_v56 = vsel %vm519_vm1, %v3420_v12, %v516_v54  ;;  %v526_v57 = vsel %vm519_vm1, %v516_v54, %v3420_v12  ;;  %v523_v58 = vsel %vm519_vm1, %v510_v55, %v518_v22  ;;  %v527_v59 = vsel %vm519_vm1, %v518_v22, %v510_v55  ;;  %v3478_v8 = vpop.permute.xlu2 %755 }
  0xc1   : > { %v539_v60 = vmul.f32 %v531_v52, %v526_v57  ;;  %v540_v61 = vmul.f32 %v532_v53, %v522_v56  ;;  %v541_v62 = vmul.f32 %v531_v52, %v527_v59  ;;  %v542_v63 = vmul.f32 %v532_v53, %v523_v58 }
  0xc3   : > { %v545_v9 = vpack.c.bf16 %v540_v61, %v539_v60  ;;  %v546_v10 = vpack.c.bf16 %v542_v63, %v541_v62 }
  0xc4   : > { %v2807_v13 = vld [vmem:[#allocation2 + $0x64] sm:$0xf0]  ;;  %v2492_v14 = vld [vmem:[#allocation2 + $0x68] sm:$0xf0] }
  0xc5   : > { %549 = vst [vmem:[#allocation2 + $0x50] sm:$0xff] %v545_v9  ;;  %665 = vrot.lane.b32.xlu1 %v3341_v6, %s3136_s22  ;;  %663 = vrot.lane.b32.xlu0 %v3344_v7, %s3136_s22  ;;  %v2490_v12 = vld [vmem:[#allocation2 + $0x60] sm:$0xf]  ;;  %v2806_v15 = vld [vmem:[#allocation2 + $0x64] sm:$0xf] }
  0xc6   : > { %550 = vst [vmem:[#allocation2 + $0x58] sm:$0xff] %v546_v10  ;;  %v2491_v16 = vor.u32 %v2807_v13, %v2490_v12  ;;  %v2495_v17 = vor.u32 %v2806_v15, %v2492_v14  ;;  %611 = vrot.lane.b32.xlu2 %v3314_v1, %s3137_s25 }
  0xc7   : > { %v506_v18 = vpop.permute.xlu1 %505  ;;  %v504_v19 = vpop.permute.xlu0 %503 }
  0xc8   : > { %1085 = vmatpush.bf16.msra.mxu0 %v2491_v16  ;;  %1142 = vmatpush.bf16.msra.mxu3 %v2495_v17  ;;  %v520_v20 = vsel %vm519_vm1, %v504_v19, %v3443_v30  ;;  %v524_v21 = vsel %vm519_vm1, %v3443_v30, %v504_v19  ;;  %v3492_v24 = vpop.permute.xlu2 %765 }
  0xc9   : > { %v535_v22 = vmul.f32 %v531_v52, %v524_v21  ;;  %v536_v23 = vmul.f32 %v532_v53, %v520_v20 }
  0xcb   : > { %v543_v25 = vpack.c.bf16 %v536_v23, %v535_v22 }
  0xcc   : > { %v2482_v26 = vld [vmem:[#allocation2 + $0x50] sm:$0xf]  ;;  %v2804_v27 = vld [vmem:[#allocation2 + $0x54] sm:$0xf] }
  0xcd   : > { %547 = vst [vmem:[#allocation2 + $0x40] sm:$0xff] %v543_v25  ;;  %619 = vrot.lane.b32.xlu1 %v3311_v0, %s3137_s25  ;;  %613 = vrot.lane.b32.xlu0 %v3329_v4, %s3137_s25  ;;  %v2805_v28 = vld [vmem:[#allocation2 + $0x54] sm:$0xf0]  ;;  %v2484_v29 = vld [vmem:[#allocation2 + $0x58] sm:$0xf0] }
  0xce   : > { %v2483_v30 = vor.u32 %v2805_v28, %v2482_v26  ;;  %v2487_v31 = vor.u32 %v2804_v27, %v2484_v29  ;;  %621 = vrot.lane.b32.xlu2 %v3326_v3, %s3137_s25 }
  0xcf   : > { %v460_v32 = vpop.permute.xlu1 %459  ;;  %v514_v33 = vpop.permute.xlu0 %513 }
  0xd0   : > { %v521_v34 = vsel %vm519_vm1, %v506_v18, %v514_v33  ;;  %v525_v35 = vsel %vm519_vm1, %v514_v33, %v506_v18  ;;  %1086 = vmatpush.bf16.msra.mxu0 %v2483_v30  ;;  %1143 = vmatpush.bf16.msra.mxu3 %v2487_v31  ;;  %v3504_v38 = vpop.permute.xlu2 %463 }
  0xd1   : > { %v537_v36 = vmul.f32 %v531_v52, %v525_v35  ;;  %v538_v37 = vmul.f32 %v532_v53, %v521_v34 }
  0xd3   : > { %v544_v40 = vpack.c.bf16 %v538_v37, %v537_v36 }
  0xd4   : > { %v2474_v57 = vld [vmem:[#allocation2 + $0x40] sm:$0xf]  ;;  %v2802_v59 = vld [vmem:[#allocation2 + $0x44] sm:$0xf] }
  0xd5   : > { %548 = vst [vmem:[#allocation2 + $0x48] sm:$0xff] %v544_v40  ;;  %607 = vrot.lane.b32.xlu0 %v3321_v2, %s3137_s25  ;;  %609 = vrot.lane.b32.xlu1 %v3332_v5, %s3137_s25 }
  0xd6   : > { %615 = vrot.lane.b32.xlu2 %v3344_v7, %s3137_s25 }
  0xd7   : > { %v470_v44 = vpop.permute.xlu1 %469  ;;  %v468_v45 = vpop.permute.xlu0 %467 }
  0xd8   : > { %v475_v46 = vsel %vm471_vm2, %v3459_v42, %v470_v44  ;;  %v479_v47 = vsel %vm471_vm2, %v470_v44, %v3459_v42  ;;  %v474_v48 = vsel %vm471_vm2, %v460_v32, %v468_v45  ;;  %v478_v49 = vsel %vm471_vm2, %v468_v45, %v460_v32  ;;  %v3531_v54 = vpop.permute.xlu2 %753  ;;  %v777_v42 = vld [vmem:[#allocation6 + $0x10] ss:$8 sm:$0x3] }
  0xd9   : > { %v493_v50 = vmul.f32 %v3509_v41, %v479_v47  ;;  %v494_v51 = vmul.f32 %v3511_v43, %v475_v46  ;;  %v491_v52 = vmul.f32 %v3509_v41, %v478_v49  ;;  %v492_v53 = vmul.f32 %v3511_v43, %v474_v48 }
  0xda   : > { %v779_v61 = vperm.slane %v777_v42, 0  ;;  %v780_v62 = vperm.slane %v777_v42, 1 }
  0xdb   : > { %v498_v55 = vpack.c.bf16 %v494_v51, %v493_v50  ;;  %v497_v56 = vpack.c.bf16 %v492_v53, %v491_v52 }
  0xdc   : > { %v2803_v58 = vld [vmem:[#allocation2 + $0x44] sm:$0xf0]  ;;  %v2476_v60 = vld [vmem:[#allocation2 + $0x48] sm:$0xf0] }
  0xdd   : > { %502 = vst [vmem:[#allocation2 + $0x38] sm:$0xff] %v498_v55  ;;  %617 = vrot.lane.b32.xlu0 %v3341_v6, %s3137_s25  ;;  %v2475_v63 = vor.u32 %v2803_v58, %v2474_v57  ;;  %v2479_v9 = vor.u32 %v2802_v59, %v2476_v60  ;;  %v433_v59 = vld [vmem:[#allocation6] ss:$8 sm:$0x3] }
  0xde   : > { %501 = vst [vmem:[#allocation2 + $0x30] sm:$0xff] %v497_v56 }
  0xdf   : > { %v764_v10 = vpop.permute.xlu1 %763  ;;  %v758_v13 = vpop.permute.xlu0 %757  ;;  %1087 = vmatpush.bf16.msra.mxu0 %v2475_v63  ;;  %1144 = vmatpush.bf16.msra.mxu3 %v2479_v9 }
  0xe0   : > { %v770_v14 = vsel %vm767_vm3, %v3478_v8, %v764_v10  ;;  %v774_v12 = vsel %vm767_vm3, %v764_v10, %v3478_v8  ;;  %v771_v15 = vsel %vm767_vm3, %v758_v13, %v3492_v24  ;;  %v775_v16 = vsel %vm767_vm3, %v3492_v24, %v758_v13  ;;  %v3548_v21 = vpop.permute.xlu2 %410 }
  0xe1   : > { %v787_v17 = vmul.f32 %v779_v61, %v770_v14  ;;  %v788_v18 = vmul.f32 %v780_v62, %v774_v12  ;;  %v789_v19 = vmul.f32 %v779_v61, %v771_v15  ;;  %v790_v20 = vmul.f32 %v780_v62, %v775_v16 }
  0xe2   : > { %v3577_v12 = vperm.slane %v433_v59, 1 }
  0xe3   : > { %v793_v22 = vpack.c.bf16 %v788_v18, %v787_v17  ;;  %v794_v23 = vpack.c.bf16 %v790_v20, %v789_v19 }
  0xe4   : > { %v2801_v25 = vld [vmem:[#allocation2 + $0x34] sm:$0xf0]  ;;  %v2468_v26 = vld [vmem:[#allocation2 + $0x38] sm:$0xf0] }
  0xe5   : > { %797 = vst [vmem:[#allocation2 + $0x110] sm:$0xff] %v793_v22  ;;  %v2466_v8 = vld [vmem:[#allocation2 + $0x30] sm:$0xf]  ;;  %v2800_v27 = vld [vmem:[#allocation2 + $0x34] sm:$0xf] }
  0xe6   : > { %798 = vst [vmem:[#allocation2 + $0x118] sm:$0xff] %v794_v23  ;;  %v2467_v28 = vor.u32 %v2801_v25, %v2466_v8  ;;  %v2471_v29 = vor.u32 %v2800_v27, %v2468_v26  ;;  %v729_v27 = vld [vmem:[#allocation6 + $0x7] ss:$8 sm:$0x3] }
  0xe7   : > { %v458_v30 = vpop.permute.xlu1 %457  ;;  %v456_v31 = vpop.permute.xlu0 %455 }
  0xe8   : > { %1088 = vmatpush.bf16.msra.mxu0 %v2467_v28  ;;  %1145 = vmatpush.bf16.msra.mxu3 %v2471_v29  ;;  %v472_v24 = vsel %vm471_vm2, %v456_v31, %v3504_v38  ;;  %v476_v32 = vsel %vm471_vm2, %v3504_v38, %v456_v31  ;;  %v421_v35 = vpop.permute.xlu2 %420  ;;  %v731_v31 = vperm.slane %v729_v27, 0 }
  0xe9   : > { %v487_v33 = vmul.f32 %v3509_v41, %v476_v32  ;;  %v488_v34 = vmul.f32 %v3511_v43, %v472_v24  ;;  %v732_v24 = vperm.slane %v729_v27, 1 }
  0xeb   : > { %v495_v36 = vpack.c.bf16 %v488_v34, %v487_v33 }
  0xec   : > { %v2578_v37 = vld [vmem:[#allocation2 + $0x110] sm:$0xf] }
  0xed   : > { %499 = vst [vmem:[#allocation2 + $0x20] sm:$0xff] %v495_v36  ;;  %v2829_v39 = vld [vmem:[#allocation2 + $0x114] sm:$0xf0] }
  0xee   : > { %v2579_v40 = vor.u32 %v2829_v39, %v2578_v37 }
  0xef   : > { %v752_v44 = vpop.permute.xlu1 %751  ;;  %v466_v45 = vpop.permute.xlu0 %465 }
  0xf0   : > { %v473_v46 = vsel %vm471_vm2, %v458_v30, %v466_v45  ;;  %v477_v47 = vsel %vm471_vm2, %v466_v45, %v458_v30  ;;  %1128 = vmatpush.bf16.msra.mxu2 %v2579_v40  ;;  %v716_v50 = vpop.permute.xlu2 %715 }
  0xf1   : > { %v489_v38 = vmul.f32 %v3509_v41, %v477_v47  ;;  %v490_v48 = vmul.f32 %v3511_v43, %v473_v46 }
  0xf3   : > { %v496_v49 = vpack.c.bf16 %v490_v48, %v489_v38 }
  0xf4   : > { %v2458_v9 = vld [vmem:[#allocation2 + $0x20] sm:$0xf]  ;;  %v2798_v13 = vld [vmem:[#allocation2 + $0x24] sm:$0xf] }
  0xf5   : > { %500 = vst [vmem:[#allocation2 + $0x28] sm:$0xff] %v496_v49 }
  0xf7   : > { %v762_v51 = vpop.permute.xlu1 %761  ;;  %v760_v52 = vpop.permute.xlu0 %759 }
  0xf8   : > { %v769_v53 = vsel %vm767_vm3, %v3531_v54, %v762_v51  ;;  %v773_v42 = vsel %vm767_vm3, %v762_v51, %v3531_v54  ;;  %v768_v55 = vsel %vm767_vm3, %v752_v44, %v760_v52  ;;  %v772_v41 = vsel %vm767_vm3, %v760_v52, %v752_v44  ;;  %v409_v17 = vpop.permute.xlu2 %408 }
  0xf9   : > { %v785_v43 = vmul.f32 %v779_v61, %v769_v53  ;;  %v786_v56 = vmul.f32 %v780_v62, %v773_v42  ;;  %v783_v57 = vmul.f32 %v779_v61, %v768_v55  ;;  %v784_v58 = vmul.f32 %v780_v62, %v772_v41 }
  0xfa   : > { %v3575_v54 = vperm.slane %v433_v59, 0 }
  0xfb   : > { %v792_v60 = vpack.c.bf16 %v786_v56, %v785_v43  ;;  %v791_v63 = vpack.c.bf16 %v784_v58, %v783_v57 }
  0xfc   : > { %v2799_v10 = vld [vmem:[#allocation2 + $0x24] sm:$0xf0]  ;;  %v2460_v14 = vld [vmem:[#allocation2 + $0x28] sm:$0xf0] }
  0xfd   : > { %796 = vst [vmem:[#allocation2 + $0x108] sm:$0xff] %v792_v60  ;;  %v2459_v15 = vor.u32 %v2799_v10, %v2458_v9  ;;  %v2463_v16 = vor.u32 %v2798_v13, %v2460_v14 }
  0xfe   : > { %795 = vst [vmem:[#allocation2 + $0x100] sm:$0xff] %v791_v63 }
  0xff   : > { %v419_v61 = vpop.permute.xlu1 %418  ;;  %v413_v62 = vpop.permute.xlu0 %412  ;;  %1089 = vmatpush.bf16.msra.mxu0 %v2459_v15  ;;  %1146 = vmatpush.bf16.msra.mxu3 %v2463_v16 }
 0x100   : > { %v427_v18 = vsel %vm424_vm4, %v3548_v21, %v419_v61  ;;  %v431_v19 = vsel %vm424_vm4, %v419_v61, %v3548_v21  ;;  %v428_v20 = vsel %vm424_vm4, %v413_v62, %v421_v35  ;;  %v432_v22 = vsel %vm424_vm4, %v421_v35, %v413_v62  ;;  %v704_v37 = vpop.permute.xlu2 %703 }
 0x101   : > { %v443_v23 = vmul.f32 %v3575_v54, %v431_v19  ;;  %v444_v25 = vmul.f32 %v3577_v12, %v427_v18  ;;  %v445_v26 = vmul.f32 %v3575_v54, %v432_v22  ;;  %v446_v8 = vmul.f32 %v3577_v12, %v428_v20 }
 0x103   : > { %v449_v28 = vpack.c.bf16 %v444_v25, %v443_v23  ;;  %v450_v29 = vpack.c.bf16 %v446_v8, %v445_v26 }
 0x104   : > { %v2827_v30 = vld [vmem:[#allocation2 + $0x104] sm:$0xf0] }
 0x105   : > { %453 = vst [vmem:[#allocation2 + $0x10] sm:$0xff] %v449_v28  ;;  %v2570_v21 = vld [vmem:[#allocation2 + $0x100] sm:$0xf] }
 0x106   : > { %454 = vst [vmem:[#allocation2 + $0x18] sm:$0xff] %v450_v29  ;;  %v2571_v32 = vor.u32 %v2827_v30, %v2570_v21  ;;  %v681_v21 = vld [vmem:[#allocation6 + $0x6] ss:$8 sm:$0x3] }
 0x107   : > { %v710_v33 = vpop.permute.xlu1 %709  ;;  %v708_v34 = vpop.permute.xlu0 %707 }
 0x108   : > { %1129 = vmatpush.bf16.msra.mxu2 %v2571_v32  ;;  %v722_v35 = vsel %vm719_vm5, %v708_v34, %v716_v50  ;;  %v726_v36 = vsel %vm719_vm5, %v716_v50, %v708_v34  ;;  %v714_v41 = vpop.permute.xlu2 %713  ;;  %v2828_v34 = vld [vmem:[#allocation2 + $0x114] sm:$0xf] }
 0x109   : > { %v739_v39 = vmul.f32 %v731_v31, %v722_v35  ;;  %v740_v40 = vmul.f32 %v732_v24, %v726_v36  ;;  %v2580_v35 = vld [vmem:[#allocation2 + $0x118] sm:$0xf0] }
 0x10b   : > { %v745_v44 = vpack.c.bf16 %v740_v40, %v739_v39 }
 0x10c   : > { %v2450_v45 = vld [vmem:[#allocation2 + $0x10] sm:$0xf]  ;;  %v2796_v46 = vld [vmem:[#allocation2 + $0x14] sm:$0xf] }
 0x10d   : > { %749 = vst [vmem:[#allocation2 + $0xf0] sm:$0xff] %v745_v44  ;;  %v2797_v47 = vld [vmem:[#allocation2 + $0x14] sm:$0xf0]  ;;  %v2452_v38 = vld [vmem:[#allocation2 + $0x18] sm:$0xf0] }
 0x10e   : > { %v2451_v48 = vor.u32 %v2797_v47, %v2450_v45  ;;  %v2455_v49 = vor.u32 %v2796_v46, %v2452_v38  ;;  %v684_v45 = vperm.slane %v681_v21, 1 }
 0x10f   : > { %v407_v51 = vpop.permute.xlu1 %406  ;;  %v718_v52 = vpop.permute.xlu0 %717 }
 0x110   : > { %v723_v53 = vsel %vm719_vm5, %v710_v33, %v718_v52  ;;  %v727_v42 = vsel %vm719_vm5, %v718_v52, %v710_v33  ;;  %1090 = vmatpush.bf16.msra.mxu0 %v2451_v48  ;;  %1147 = vmatpush.bf16.msra.mxu3 %v2455_v49  ;;  %v668_v19 = vpop.permute.xlu2 %667  ;;  %v2583_v48 = vor.u32 %v2828_v34, %v2580_v35  ;;  %v2572_v49 = vld [vmem:[#allocation2 + $0x108] sm:$0xf0] }
 0x111   : > { %v741_v50 = vmul.f32 %v731_v31, %v723_v53  ;;  %v742_v55 = vmul.f32 %v732_v24, %v727_v42  ;;  %v2826_v53 = vld [vmem:[#allocation2 + $0x104] sm:$0xf]  ;;  %v2426_v42 = vld [vmem:[%s4401_s2 + $0x8] sm:$0xf]  ;;  %v601_v35 = vpack.c.bf16 %v3311_v0, %v3314_v1  ;;  %v599_v0 = vpack.c.bf16 %v3344_v7, %v3321_v2 }
 0x112   : > { %v633_v34 = vld [vmem:[#allocation6 + $0x5] ss:$8 sm:$0x3] }
 0x113   : > { %v746_v43 = vpack.c.bf16 %v742_v55, %v741_v50  ;;  %v2790_v50 = vld [vmem:[%s4401_s2 + $0x10] sm:$0xf0]  ;;  %605 = vst [vmem:[#allocation2 + $0x90] sm:$0xff] %v601_v35  ;;  %v3680_v1 = vperm.slane %v633_v34, 1  ;;  %v2792_v2 = vld [vmem:[%s4401_s2 + $0x20] sm:$0xf0] }
 0x114   : > { %v2562_v61 = vld [vmem:[#allocation2 + $0xf0] sm:$0xf]  ;;  %v2824_v18 = vld [vmem:[#allocation2 + $0xf4] sm:$0xf]  ;;  %603 = vst [vmem:[#allocation2 + $0x80] sm:$0xff] %v599_v0 }
 0x115   : > { %750 = vst [vmem:[#allocation2 + $0xf8] sm:$0xff] %v746_v43  ;;  %v3636_v43 = vor.u32 %v2790_v50, %v2426_v42 }
 0x117   : > { %v417_v56 = vpop.permute.xlu1 %416  ;;  %v415_v57 = vpop.permute.xlu0 %414  ;;  %2584 = vmatmul.msk.bf16.vlgmr.msra.gmra.mxu2 %vm1077_vm7, %v3636_v43 }
 0x118   : > { %v426_v58 = vsel %vm424_vm4, %v409_v17, %v417_v56  ;;  %v430_v59 = vsel %vm424_vm4, %v417_v56, %v409_v17  ;;  %v425_v60 = vsel %vm424_vm4, %v407_v51, %v415_v57  ;;  %v429_v63 = vsel %vm424_vm4, %v415_v57, %v407_v51 }
 0x119   : > { %v441_v9 = vmul.f32 %v3575_v54, %v430_v59  ;;  %v442_v10 = vmul.f32 %v3577_v12, %v426_v58  ;;  %v439_v13 = vmul.f32 %v3575_v54, %v429_v63  ;;  %v440_v14 = vmul.f32 %v3577_v12, %v425_v60 }
 0x11a   : > { %v2575_v57 = vor.u32 %v2826_v53, %v2572_v49  ;;  %v2812_v35 = vld [vmem:[#allocation2 + $0x94] sm:$0xf] }
 0x11b   : > { %v448_v15 = vpack.c.bf16 %v442_v10, %v441_v9  ;;  %v447_v16 = vpack.c.bf16 %v440_v14, %v439_v13 }
 0x11c   : > { %v2825_v62 = vld [vmem:[#allocation2 + $0xf4] sm:$0xf0]  ;;  %v2564_v17 = vld [vmem:[#allocation2 + $0xf8] sm:$0xf0] }
 0x11d   : > { %452 = vst [vmem:[#allocation2 + $0x8] sm:$0xff] %v448_v15  ;;  %v2563_v20 = vor.u32 %v2825_v62, %v2562_v61  ;;  %v2567_v22 = vor.u32 %v2824_v18, %v2564_v17  ;;  %v2418_v61 = vld [vmem:[%s4401_s2] sm:$0xf]  ;;  %v2789_v62 = vld [vmem:[%s4401_s2 + $0x8] sm:$0xf0] }
 0x11e   : > { %451 = vst [vmem:[#allocation2] sm:$0xff] %v447_v16 }
 0x11f   : > { %v712_v23 = vpop.permute.xlu1 %711  ;;  %v706_v25 = vpop.permute.xlu0 %705  ;;  %1103 = vmatpush.bf16.msra.mxu1 %v2563_v20  ;;  %1160 = vmatpush.bf16.msrb.mxu2 %v2567_v22  ;;  %v2419_v20 = vor.u32 %v2789_v62, %v2418_v61  ;;  %v3138_v62 = vmov 0  }
 0x120   : > { %v720_v54 = vsel %vm719_vm5, %v704_v37, %v712_v23  ;;  %v724_v12 = vsel %vm719_vm5, %v712_v23, %v704_v37  ;;  %v721_v26 = vsel %vm719_vm5, %v706_v25, %v714_v41  ;;  %v725_v8 = vsel %vm719_vm5, %v714_v41, %v706_v25  ;;  %v2438_v23 = vld [vmem:[%s4401_s2 + $0x20] sm:$0xf]  ;;  %v2793_v25 = vld [vmem:[%s4401_s2 + $0x28] sm:$0xf0]  ;;  %2960 = vset.pattern.permute.xlu1 %v3138_v62 }
 0x121   : > { %v735_v27 = vmul.f32 %v731_v31, %v720_v54  ;;  %v736_v28 = vmul.f32 %v732_v24, %v724_v12  ;;  %v737_v29 = vmul.f32 %v731_v31, %v721_v26  ;;  %v738_v30 = vmul.f32 %v732_v24, %v725_v8  ;;  %v658_v31 = vpop.permute.xlu2 %657  ;;  %2962 = vset.pattern.permute.xlu0 %v3138_v62 }
 0x122   : > { %v3623_v37 = vperm.slane %v681_v21, 0  ;;  %v3657_v26 = vor.u32 %v2793_v25, %v2438_v23  ;;  %2961 = vset.pattern.permute.xlu2 %v3138_v62 }
 0x123   : > { %v743_v32 = vpack.c.bf16 %v736_v28, %v735_v27  ;;  %v744_v33 = vpack.c.bf16 %v738_v30, %v737_v29 }
 0x124   : > { %v2795_v36 = vld [vmem:[#allocation2 + $0x4] sm:$0xf0]  ;;  %v2444_v39 = vld [vmem:[#allocation2 + $0x8] sm:$0xf0] }
 0x125   : > { %747 = vst [vmem:[#allocation2 + $0xe0] sm:$0xff] %v743_v32  ;;  %v2442_v40 = vld [vmem:[#allocation2] sm:$0xf]  ;;  %v2794_v44 = vld [vmem:[#allocation2 + $0x4] sm:$0xf] }
 0x126   : > { %748 = vst [vmem:[#allocation2 + $0xe8] sm:$0xff] %v744_v33  ;;  %v2443_v46 = vor.u32 %v2795_v36, %v2442_v40  ;;  %v2447_v47 = vor.u32 %v2794_v44, %v2444_v39 }
 0x127   : > { %v662_v24 = vpop.permute.xlu1 %661  ;;  %v660_v38 = vpop.permute.xlu0 %659  ;;  %2585 = vmatmul.msk.bf16.gmra.mxu2 %vm1077_vm7, %v3657_v26 }
 0x128   : > { %1091 = vmatpush.bf16.msra.mxu0 %v2443_v46  ;;  %1148 = vmatpush.bf16.msra.mxu3 %v2447_v47  ;;  %v674_v51 = vsel %vm671_vm6, %v660_v38, %v668_v19  ;;  %v678_v52 = vsel %vm671_vm6, %v668_v19, %v660_v38  ;;  %v602_v47 = vpack.c.bf16 %v3326_v3, %v3329_v4  ;;  %v2430_v3 = vld [vmem:[%s4401_s2 + $0x18] sm:$0xf] }
 0x129   : > { %v691_v55 = vmul.f32 %v3623_v37, %v674_v51  ;;  %v692_v41 = vmul.f32 %v684_v45, %v678_v52  ;;  %v612_v19 = vpop.permute.xlu2 %611 }
 0x12a   : > { %606 = vst [vmem:[#allocation2 + $0x98] sm:$0xff] %v602_v47 }
 0x12b   : > { %v697_v56 = vpack.c.bf16 %v692_v41, %v691_v55  ;;  %1092 = vmatmul.bf16.vlgmr.msra.gmra.mxu0 %v2419_v20  ;;  %1149 = vmatmul.bf16.vlgmr.msra.gmra.mxu3 %v2419_v20  ;;  %v2431_v55 = vor.u32 %v2792_v2, %v2430_v3  ;;  %v2788_v3 = vld [vmem:[%s4401_s2 + $0x4] sm:$0xf]  ;;  %v2420_v2 = vld [vmem:[%s4401_s2 + $0xc] sm:$0xf0] }
 0x12c   : > { %1185 = vmatpush.bf16.msrb.mxu0 %v2583_v48  ;;  %v2554_v58 = vld [vmem:[#allocation2 + $0xe0] sm:$0xf]  ;;  %v2822_v59 = vld [vmem:[#allocation2 + $0xe4] sm:$0xf]  ;;  %v600_v48 = vpack.c.bf16 %v3341_v6, %v3332_v5 }
 0x12d   : > { %701 = vst [vmem:[#allocation2 + $0xd0] sm:$0xff] %v697_v56  ;;  %v2823_v60 = vld [vmem:[#allocation2 + $0xe4] sm:$0xf0]  ;;  %v2556_v63 = vld [vmem:[#allocation2 + $0xe8] sm:$0xf0] }
 0x12e   : > { %v2555_v9 = vor.u32 %v2823_v60, %v2554_v58  ;;  %v2559_v10 = vor.u32 %v2822_v59, %v2556_v63  ;;  %604 = vst [vmem:[#allocation2 + $0x88] sm:$0xff] %v600_v48 }
 0x12f   : > { %v656_v13 = vpop.permute.xlu1 %655  ;;  %v670_v14 = vpop.permute.xlu0 %669 }
 0x130   : > { %1186 = vmatpush.bf16.msrb.mxu0 %v2575_v57  ;;  %v675_v15 = vsel %vm671_vm6, %v662_v24, %v670_v14  ;;  %v679_v16 = vsel %vm671_vm6, %v670_v14, %v662_v24  ;;  %1104 = vmatpush.bf16.msra.mxu1 %v2555_v9 }
 0x131   : > { %1161 = vmatpush.bf16.msrb.mxu2 %v2559_v10  ;;  %v693_v18 = vmul.f32 %v3623_v37, %v675_v15  ;;  %v694_v17 = vmul.f32 %v684_v45, %v679_v16  ;;  %v622_v46 = vpop.permute.xlu2 %621 }
 0x133   : > { %v698_v22 = vpack.c.bf16 %v694_v17, %v693_v18  ;;  %v845_v18 = vld [vmem:[%s4402_s3 + $0x10] sm:$0xff]  ;;  %v843_v17 = vld [vmem:[%s4402_s3] sm:$0xff] }
 0x134   : > { %v2546_v40 = vld [vmem:[#allocation2 + $0xd0] sm:$0xf]  ;;  %v2820_v44 = vld [vmem:[#allocation2 + $0xd4] sm:$0xf]  ;;  %859 = vperm.xlu1 %2960, %v845_v18   ;;  %849 = vperm.xlu0 %2962, %v843_v17  }
 0x135   : > { %702 = vst [vmem:[#allocation2 + $0xd8] sm:$0xff] %v698_v22  ;;  %v2508_v48 = vld [vmem:[#allocation2 + $0x88] sm:$0xf0] }
 0x137   : > { %v666_v54 = vpop.permute.xlu1 %665  ;;  %v664_v12 = vpop.permute.xlu0 %663 }
 0x138   : > { %v673_v8 = vsel %vm671_vm6, %v658_v31, %v666_v54  ;;  %v677_v27 = vsel %vm671_vm6, %v666_v54, %v658_v31  ;;  %v672_v28 = vsel %vm671_vm6, %v656_v13, %v664_v12  ;;  %v676_v29 = vsel %vm671_vm6, %v664_v12, %v656_v13 }
 0x139   : > { %v689_v30 = vmul.f32 %v3623_v37, %v673_v8  ;;  %v690_v21 = vmul.f32 %v684_v45, %v677_v27  ;;  %v687_v32 = vmul.f32 %v3623_v37, %v672_v28  ;;  %v688_v33 = vmul.f32 %v684_v45, %v676_v29  ;;  %v616_v63 = vpop.permute.xlu2 %615 }
 0x13a   : > { %v3676_v31 = vperm.slane %v633_v34, 0  ;;  %v2514_v34 = vld [vmem:[#allocation2 + $0x90] sm:$0xf] }
 0x13b   : > { %v696_v36 = vpack.c.bf16 %v690_v21, %v689_v30  ;;  %v695_v39 = vpack.c.bf16 %v688_v33, %v687_v32  ;;  %1097 = vmatmul.bf16.gmra.mxu0 %v2431_v55  ;;  %1154 = vmatmul.bf16.gmra.mxu3 %v2431_v55  ;;  %v844_v30 = vld [vmem:[%s4402_s3 + $0x8] sm:$0xff] }
 0x13c   : > { %v2821_v37 = vld [vmem:[#allocation2 + $0xd4] sm:$0xf0]  ;;  %v2548_v45 = vld [vmem:[#allocation2 + $0xd8] sm:$0xf0]  ;;  %854 = vperm.xlu1 %2960, %v844_v30  }
 0x13d   : > { %700 = vst [vmem:[#allocation2 + $0xc8] sm:$0xff] %v696_v36  ;;  %v2547_v24 = vor.u32 %v2821_v37, %v2546_v40  ;;  %v2551_v38 = vor.u32 %v2820_v44, %v2548_v45  ;;  %v846_v36 = vld [vmem:[%s4402_s3 + $0x18] sm:$0xff] }
 0x13e   : > { %699 = vst [vmem:[#allocation2 + $0xc0] sm:$0xff] %v695_v39  ;;  %v2813_v40 = vld [vmem:[#allocation2 + $0x94] sm:$0xf0]  ;;  %v2516_v44 = vld [vmem:[#allocation2 + $0x98] sm:$0xf0]  ;;  %864 = vperm.xlu2 %2961, %v846_v36  }
 0x13f   : > { %v620_v49 = vpop.permute.xlu1 %619  ;;  %v614_v51 = vpop.permute.xlu0 %613  ;;  %1105 = vmatpush.bf16.msra.mxu1 %v2547_v24  ;;  %1162 = vmatpush.bf16.msrb.mxu2 %v2551_v38  ;;  %v2515_v0 = vor.u32 %v2813_v40, %v2514_v34  ;;  %v2811_v24 = vld [vmem:[#allocation2 + $0x84] sm:$0xf0]  ;;  %v2810_v38 = vld [vmem:[#allocation2 + $0x84] sm:$0xf] }
 0x140   : > { %v626_v4 = vsel %vm623_vm8, %v612_v19, %v620_v49  ;;  %v630_v5 = vsel %vm623_vm8, %v620_v49, %v612_v19  ;;  %v627_v6 = vsel %vm623_vm8, %v614_v51, %v622_v46  ;;  %v631_v7 = vsel %vm623_vm8, %v622_v46, %v614_v51 }
 0x141   : > { %v643_v52 = vmul.f32 %v3676_v31, %v626_v4  ;;  %v644_v53 = vmul.f32 %v3680_v1, %v630_v5  ;;  %v645_v42 = vmul.f32 %v3676_v31, %v627_v6  ;;  %v646_v50 = vmul.f32 %v3680_v1, %v631_v7  ;;  %v2791_v5 = vld [vmem:[%s4401_s2 + $0x1c] sm:$0xf]  ;;  %v2432_v6 = vld [vmem:[%s4401_s2 + $0x24] sm:$0xf0] }
 0x142   : > { %v2511_v51 = vor.u32 %v2810_v38, %v2508_v48  ;;  %v2423_v4 = vor.u32 %v2788_v3, %v2420_v2  ;;  %v2435_v7 = vor.u32 %v2791_v5, %v2432_v6 }
 0x143   : > { %v649_v41 = vpack.c.bf16 %v644_v53, %v643_v52  ;;  %v650_v56 = vpack.c.bf16 %v646_v50, %v645_v42 }
 0x144   : > { %v2819_v57 = vld [vmem:[#allocation2 + $0xc4] sm:$0xf0]  ;;  %v2540_v58 = vld [vmem:[#allocation2 + $0xc8] sm:$0xf0] }
 0x145   : > { %653 = vst [vmem:[#allocation2 + $0xb0] sm:$0xff] %v649_v41  ;;  %v2538_v59 = vld [vmem:[#allocation2 + $0xc0] sm:$0xf]  ;;  %v2818_v60 = vld [vmem:[#allocation2 + $0xc4] sm:$0xf] }
 0x146   : > { %654 = vst [vmem:[#allocation2 + $0xb8] sm:$0xff] %v650_v56  ;;  %v2539_v9 = vor.u32 %v2819_v57, %v2538_v59  ;;  %v2543_v10 = vor.u32 %v2818_v60, %v2540_v58 }
 0x147   : > { %v608_v13 = vpop.permute.xlu0 %607  ;;  %v610_v23 = vpop.permute.xlu1 %609 }
 0x148   : > { %1106 = vmatpush.bf16.msra.mxu1 %v2539_v9  ;;  %1163 = vmatpush.bf16.msrb.mxu2 %v2543_v10  ;;  %v624_v14 = vsel %vm623_vm8, %v608_v13, %v616_v63  ;;  %v628_v15 = vsel %vm623_vm8, %v616_v63, %v608_v13 }
 0x149   : > { %v639_v16 = vmul.f32 %v3676_v31, %v624_v14  ;;  %v640_v61 = vmul.f32 %v3680_v1, %v628_v15 }
 0x14b   : > { %v647_v19 = vpack.c.bf16 %v640_v61, %v639_v16  ;;  %2586 = vmatmul.msk.bf16.vlgmr.msrb.gmra.mxu0 %vm1077_vm7, %v3636_v43  ;;  %v2519_v43 = vor.u32 %v2812_v35, %v2516_v44 }
 0x14c   : > { %v2530_v20 = vld [vmem:[#allocation2 + $0xb0] sm:$0xf]  ;;  %v2816_v22 = vld [vmem:[#allocation2 + $0xb4] sm:$0xf] }
 0x14d   : > { %651 = vst [vmem:[#allocation2 + $0xa0] sm:$0xff] %v647_v19  ;;  %v2817_v25 = vld [vmem:[#allocation2 + $0xb4] sm:$0xf0]  ;;  %v2532_v54 = vld [vmem:[#allocation2 + $0xb8] sm:$0xf0] }
 0x14e   : > { %v2531_v12 = vor.u32 %v2817_v25, %v2530_v20  ;;  %v2535_v8 = vor.u32 %v2816_v22, %v2532_v54 }
 0x14f   : > { %v618_v27 = vpop.permute.xlu0 %617 }
 0x150   : > { %v625_v28 = vsel %vm623_vm8, %v610_v23, %v618_v27  ;;  %v629_v29 = vsel %vm623_vm8, %v618_v27, %v610_v23  ;;  %1107 = vmatpush.bf16.msra.mxu1 %v2531_v12  ;;  %1164 = vmatpush.bf16.msrb.mxu2 %v2535_v8 }
 0x151   : > { %v641_v21 = vmul.f32 %v3676_v31, %v625_v28  ;;  %v642_v32 = vmul.f32 %v3680_v1, %v629_v29  ;;  %v2506_v1 = vld [vmem:[#allocation2 + $0x80] sm:$0xf] }
 0x152   : > { %v2507_v49 = vor.u32 %v2811_v24, %v2506_v1 }
 0x153   : > { %v648_v33 = vpack.c.bf16 %v642_v32, %v641_v21 }
 0x154   : > { %v2522_v39 = vld [vmem:[#allocation2 + $0xa0] sm:$0xf]  ;;  %v2814_v47 = vld [vmem:[#allocation2 + $0xa4] sm:$0xf] }
 0x155   : > { %652 = vst [vmem:[#allocation2 + $0xa8] sm:$0xff] %v648_v33 }
 0x15b   : > { %2587 = vmatmul.msk.bf16.gmra.mxu0 %vm1077_vm7, %v3657_v26 }
 0x15c   : > { %v2815_v46 = vld [vmem:[#allocation2 + $0xa4] sm:$0xf0]  ;;  %v2524_v31 = vld [vmem:[#allocation2 + $0xa8] sm:$0xf0] }
 0x15d   : > { %v2523_v37 = vor.u32 %v2815_v46, %v2522_v39  ;;  %v2527_v45 = vor.u32 %v2814_v47, %v2524_v31 }
 0x15f   : > { %1108 = vmatpush.bf16.msra.mxu1 %v2523_v37  ;;  %1165 = vmatpush.bf16.msrb.mxu2 %v2527_v45 }
 0x163   : > { %1109 = vmatpush.bf16.msra.mxu1 %v2515_v0  ;;  %1166 = vmatpush.bf16.msrb.mxu2 %v2519_v43 }
 0x167   : > { %1110 = vmatpush.bf16.msra.mxu1 %v2507_v49  ;;  %1167 = vmatpush.bf16.msrb.mxu2 %v2511_v51 }
 0x16a   : > { %1111 = vmatmul.bf16.vlgmr.msra.gmra.mxu1 %v2423_v4  ;;  %1168 = vmatmul.bf16.vlgmr.msrb.gmra.mxu2 %v2423_v4 }
 0x17a   : > { %1116 = vmatmul.bf16.gmra.mxu1 %v2435_v7  ;;  %1173 = vmatmul.bf16.gmra.mxu2 %v2435_v7 }
 0x198   : > { %v865_v36 = vpop.permute.xlu2 %864 }
 0x19a   : > { %v1131_v53 = vpop.f32.mrf.mxu2 }
 0x1a2   : > { %v1133_v26 = vpop.f32.mrf.mxu2 }
 0x1a6   : > { %v850_v56 = vpop.permute.xlu0 %849  ;;  %v860_v58 = vpop.permute.xlu1 %859 }
 0x1a8   : > { %v1093_v52 = vpop.f32.mrf.mxu0 }
 0x1a9   : > { %v1094_v60 = vadd.f32 %v1093_v52, %v850_v56 }
 0x1aa   : > { %v1136_v55 = vpop.f32.mrf.mxu2 }
 0x1ae   : > { %v1150_v57 = vpop.f32.mrf.mxu3  ;;  %v855_v61 = vpop.permute.xlu1 %854 }
 0x1af   : > { %v1151_v14 = vadd.f32 %v1150_v57, %v850_v56 }
 0x1b0   : > { %v1095_v42 = vpop.f32.mrf.mxu0 }
 0x1b1   : > { %v1096_v19 = vadd.f32 %v1095_v42, %v855_v61 }
 0x1b2   : > { %v1138_v59 = vpop.f32.mrf.mxu2 }
 0x1b6   : > { %v1152_v15 = vpop.f32.mrf.mxu3 }
 0x1b7   : > { %v1153_v54 = vadd.f32 %v1152_v15, %v855_v61 }
 0x1b8   : > { %v1098_v50 = vpop.f32.mrf.mxu0 }
 0x1b9   : > { %v1099_v21 = vadd.f32 %v1098_v50, %v860_v58 }
 0x1be   : > { %v1155_v29 = vpop.f32.mrf.mxu3 }
 0x1bf   : > { %v1156_v40 = vadd.f32 %v1155_v29, %v860_v58 }
 0x1c0   : > { %v1100_v41 = vpop.f32.mrf.mxu0 }
 0x1c1   : > { %v1101_v31 = vadd.f32 %v1100_v41, %v865_v36 }
 0x1c6   : > { %v1157_v0 = vpop.f32.mrf.mxu3 }
 0x1c7   : > { %v1158_v48 = vadd.f32 %v1157_v0, %v865_v36  ;;  %v1626_v36 = vld [vmem:[%s4404_s5] sm:$0xff] }
 0x1c8   : > { %v1188_v9 = vpop.f32.mrf.mxu0 }
 0x1d0   : > { %v1190_v22 = vpop.f32.mrf.mxu0 }
 0x1d8   : > { %v1193_v39 = vpop.f32.mrf.mxu0 }
 0x1e0   : > { %v1195_v3 = vpop.f32.mrf.mxu0 }
 0x1e7   : > { %v1112_v63 = vpop.f32.mrf.mxu1 }
 0x1e8   : > { %v1113_v10 = vadd.f32 %v1112_v63, %v1094_v60 }
 0x1ea   : > { %v1132_v13 = vadd.f32 %v1131_v53, %v1113_v10 }
 0x1ec   : > { %v3742_v16 = vmax.f32 %v1132_v13, 0.0 }
 0x1ed   : > { %v1169_v62 = vpop.f32.mrf.mxu2 }
 0x1ee   : > { %v1170_v18 = vadd.f32 %v1169_v62, %v1151_v14  ;;  %1398 = vrot.lane.b32.xlu2 %v3742_v16, %s3137_s25  ;;  %1444 = vrot.lane.b32.xlu0 %v3742_v16, %s3136_s22 }
 0x1ef   : > { %1490 = vrot.lane.b32.xlu1 %v3742_v16, %s3135_s11  ;;  %v1114_v17 = vpop.f32.mrf.mxu1 }
 0x1f0   : > { %v1189_v20 = vadd.f32 %v1188_v9, %v1170_v18  ;;  %v1115_v23 = vadd.f32 %v1114_v17, %v1096_v19  ;;  %v1468_v19 = vld [vmem:[#allocation6 + $0x6] ss:$8 sm:$0x3] }
 0x1f2   : > { %v3750_v25 = vmax.f32 %v1189_v20, 0.0  ;;  %v1134_v27 = vadd.f32 %v1133_v26, %v1115_v23  ;;  %v1514_v20 = vld [vmem:[#allocation6 + $0x7] ss:$8 sm:$0x3] }
 0x1f3   : > { %v3910_v23 = vperm.slane %v1514_v20, 0 }
 0x1f4   : > { %v1390_v12 = vpack.c.bf16 %v3750_v25, %v3742_v16  ;;  %v3760_v33 = vmax.f32 %v1134_v27, 0.0 }
 0x1f5   : > { %v1171_v8 = vpop.f32.mrf.mxu2 }
 0x1f6   : > { %1394 = vst [vmem:[#allocation2 + $0x80] sm:$0xff] %v1390_v12  ;;  %v1172_v28 = vadd.f32 %v1171_v8, %v1153_v54  ;;  %1252 = vrot.lane.b32.xlu2 %v3742_v16, %s3132_s28  ;;  %1298 = vrot.lane.b32.xlu0 %v3742_v16, %s3131_s24  ;;  %v3912_v54 = vperm.slane %v1514_v20, 1 }
 0x1f7   : > { %1344 = vrot.lane.b32.xlu1 %v3742_v16, %s4433_s19  ;;  %v1117_v30 = vpop.f32.mrf.mxu1 }
 0x1f8   : > { %v1191_v32 = vadd.f32 %v1190_v22, %v1172_v28  ;;  %v1118_v34 = vadd.f32 %v1117_v30, %v1099_v21  ;;  %v3908_v22 = vperm.slane %v1468_v19, 1 }
 0x1fa   : > { %v3762_v35 = vmax.f32 %v1191_v32, 0.0  ;;  %v1137_v47 = vadd.f32 %v1136_v55, %v1118_v34 }
 0x1fc   : > { %v1391_v44 = vpack.c.bf16 %v3762_v35, %v3760_v33  ;;  %v3772_v1 = vmax.f32 %v1137_v47, 0.0  ;;  %v1628_v47 = vld [vmem:[%s4404_s5 + $0x10] sm:$0xff] }
 0x1fd   : > { %v1174_v46 = vpop.f32.mrf.mxu2 }
 0x1fe   : > { %1395 = vst [vmem:[#allocation2 + $0x88] sm:$0xff] %v1391_v44  ;;  %v1175_v37 = vadd.f32 %v1174_v46, %v1156_v40  ;;  %1492 = vrot.lane.b32.xlu2 %v3760_v33, %s3135_s11  ;;  %1400 = vrot.lane.b32.xlu0 %v3760_v33, %s3137_s25  ;;  %v1368_v40 = vld [vmem:[#allocation6 + $0x3] ss:$8 sm:$0x3] }
 0x1ff   : > { %1446 = vrot.lane.b32.xlu1 %v3760_v33, %s3136_s22  ;;  %v1119_v45 = vpop.f32.mrf.mxu1  ;;  %v3944_v0 = vperm.slane %v1368_v40, 1 }
 0x200   : > { %v1194_v43 = vadd.f32 %v1193_v39, %v1175_v37  ;;  %v1120_v24 = vadd.f32 %v1119_v45, %v1101_v31  ;;  %v1322_v39 = vld [vmem:[#allocation6 + $0x2] ss:$8 sm:$0x3]  ;;  %v3942_v45 = vperm.slane %v1368_v40, 0 }
 0x201   : > { %v3938_v31 = vperm.slane %v1322_v39, 0  ;;  %v3940_v37 = vperm.slane %v1322_v39, 1  ;;  %v1985_v39 = vld [vmem:[%s4406_s7] sm:$0xff] }
 0x202   : > { %v1203_v38 = vmax.f32 %v1194_v43, 0.0  ;;  %v1139_v2 = vadd.f32 %v1138_v59, %v1120_v24 }
 0x204   : > { %v1392_v49 = vpack.c.bf16 %v1203_v38, %v3772_v1  ;;  %v1204_v6 = vmax.f32 %v1139_v2, 0.0 }
 0x205   : > { %v1176_v51 = vpop.f32.mrf.mxu2 }
 0x206   : > { %1396 = vst [vmem:[#allocation2 + $0x90] sm:$0xff] %v1392_v49  ;;  %v1177_v4 = vadd.f32 %v1176_v51, %v1158_v48  ;;  %1346 = vrot.lane.b32.xlu2 %v3760_v33, %s4433_s19  ;;  %1348 = vrot.lane.b32.xlu0 %v3772_v1, %s4433_s19 }
 0x207   : > { %1300 = vrot.lane.b32.xlu1 %v3760_v33, %s3131_s24 }
 0x208   : > { %v1196_v5 = vadd.f32 %v1195_v3, %v1177_v4 }
 0x20a   : > { %v3781_v7 = vmax.f32 %v1196_v5, 0.0  ;;  %v1629_v5 = vld [vmem:[%s4404_s5 + $0x18] sm:$0xff] }
 0x20c   : > { %v1393_v52 = vpack.c.bf16 %v3781_v7, %v1204_v6 }
 0x20e   : > { %1397 = vst [vmem:[#allocation2 + $0x98] sm:$0xff] %v1393_v52  ;;  %1494 = vrot.lane.b32.xlu2 %v3772_v1, %s3135_s11  ;;  %1450 = vrot.lane.b32.xlu0 %v1204_v6, %s3136_s22 }
 0x20f   : > { %1402 = vrot.lane.b32.xlu1 %v3772_v1, %s3137_s25 }
 0x216   : > { %1448 = vrot.lane.b32.xlu2 %v3772_v1, %s3136_s22  ;;  %1304 = vrot.lane.b32.xlu0 %v1204_v6, %s3131_s24 }
 0x217   : > { %1256 = vrot.lane.b32.xlu1 %v3772_v1, %s3132_s28 }
 0x21e   : > { %1302 = vrot.lane.b32.xlu2 %v3772_v1, %s3131_s24  ;;  %1498 = vrot.lane.b32.xlu0 %v3750_v25, %s3135_s11 }
 0x21f   : > { %1496 = vrot.lane.b32.xlu1 %v1204_v6, %s3135_s11 }
 0x226   : > { %1404 = vrot.lane.b32.xlu2 %v1204_v6, %s3137_s25  ;;  %1352 = vrot.lane.b32.xlu0 %v3750_v25, %s4433_s19 }
 0x227   : > { %1350 = vrot.lane.b32.xlu1 %v1204_v6, %s4433_s19 }
 0x22e   : > { %1258 = vrot.lane.b32.xlu2 %v1204_v6, %s3132_s28  ;;  %1454 = vrot.lane.b32.xlu0 %v3762_v35, %s3136_s22 }
 0x22f   : > { %1406 = vrot.lane.b32.xlu1 %v3750_v25, %s3137_s25 }
 0x236   : > { %1452 = vrot.lane.b32.xlu2 %v3750_v25, %s3136_s22  ;;  %1308 = vrot.lane.b32.xlu0 %v3762_v35, %s3131_s24 }
 0x237   : > { %1500 = vrot.lane.b32.xlu1 %v3762_v35, %s3135_s11 }
 0x23e   : > { %1306 = vrot.lane.b32.xlu2 %v3750_v25, %s3131_s24  ;;  %1410 = vrot.lane.b32.xlu0 %v1203_v38, %s3137_s25 }
 0x23f   : > { %1354 = vrot.lane.b32.xlu1 %v3762_v35, %s4433_s19 }
 0x246   : > { %1408 = vrot.lane.b32.xlu2 %v3762_v35, %s3137_s25  ;;  %1264 = vrot.lane.b32.xlu0 %v1203_v38, %s3132_s28 }
 0x247   : > { %1456 = vrot.lane.b32.xlu1 %v1203_v38, %s3136_s22 }
 0x248   : > { %v3823_v53 = vpop.permute.xlu2 %1398 }
 0x24e   : > { %1502 = vrot.lane.b32.xlu2 %v1203_v38, %s3135_s11  ;;  %1504 = vrot.lane.b32.xlu0 %v3781_v7, %s3135_s11  ;;  %s4435_s11 = smov 17  }
 0x24f   : > { %1310 = vrot.lane.b32.xlu1 %v1203_v38, %s3131_s24 }
 0x250   : > { %v3829_v42 = vpop.permute.xlu2 %1252 }
 0x256   : > { %1356 = vrot.lane.b32.xlu2 %v1203_v38, %s4433_s19  ;;  %1254 = vrot.lane.b32.xlu0 %v3760_v33, %s3132_s28 }
 0x257   : > { %1260 = vrot.lane.b32.xlu1 %v3750_v25, %s3132_s28 }
 0x258   : > { %v3836_v26 = vpop.permute.xlu2 %1492 }
 0x25e   : > { %1458 = vrot.lane.b32.xlu2 %v3781_v7, %s3136_s22  ;;  %1540 = vrot.lane.b32.xlu0 %v3772_v1, %s4434_s12 }
 0x25f   : > { %1412 = vrot.lane.b32.xlu1 %v3781_v7, %s3137_s25  ;;  %s2874_s25 = sshll.u32 %s3216_s17, 6 }
 0x260   : > { %v3844_v50 = vpop.permute.xlu2 %1346  ;;  %v1445_v55 = vpop.permute.xlu0 %1444  ;;  %s2318_s29 = scalar_lea.hbm %s4409_s10, %s2874_s25 }
 0x261   : > { %v1491_v41 = vpop.permute.xlu1 %1490  ;;  %s2321_s26 = sshll.u32 %s2318_s29, 4  ;;  %s2322_s26 = int_to_ptr.hbm [resolvable:$true] %s2321_s26 }
 0x262   : > { %s3069_s30 = sshra.s32 %s2322_s26, 4  ;;  %s3070_s30 = int_to_ptr.hbm [resolvable:$true] %s3069_s30 }
 0x263   : > { %p3076_p11 = scmp.lt.s32.totalorder %s3070_s30, %s4409_s10 }
 0x266   : > { %1262 = vrot.lane.b32.xlu2 %v3762_v35, %s3132_s28  ;;  %1218 = vrot.lane.b32.xlu0 %v1203_v38, %s4435_s11 }
 0x267   : > { %1542 = vrot.lane.b32.xlu1 %v1204_v6, %s4434_s12 }
 0x268   : > { %v3850_v56 = vpop.permute.xlu2 %1494  ;;  %v3852_v57 = vpop.permute.xlu0 %1298 }
 0x269   : > { %v3854_v58 = vpop.permute.xlu1 %1344 }
 0x26e   : > { %1548 = vrot.lane.b32.xlu2 %v1203_v38, %s4434_s12  ;;  %1358 = vrot.lane.b32.xlu0 %v3781_v7, %s4433_s19  ;;  %s3071_s19 = scalar_lea.hbm %s3070_s30, 64 }
 0x26f   : > { %1210 = vrot.lane.b32.xlu1 %v3772_v1, %s4435_s11  ;;  %p3072_p1 = scmp.ne.s32.totalorder %s3070_s30, %s3071_s19 }
 0x270   : > { %v3861_v59 = vpop.permute.xlu2 %1448  ;;  %v3863_v60 = vpop.permute.xlu0 %1400 }
 0x271   : > { %v3865_v63 = vpop.permute.xlu1 %1446  ;;  %p3073_p4 = pnand %p3072_p1, %p3264_p3 }
 0x273   : > { %p3074_p8 = pneg %p3073_p4 }
 0x276   : > { %1212 = vrot.lane.b32.xlu2 %v1204_v6, %s4435_s11  ;;  %1538 = vrot.lane.b32.xlu0 %v3760_v33, %s4434_s12  ;;  %v2028_v6 = vld [vmem:[%s4408_s9] sm:$0xff] }
 0x277   : > { %1544 = vrot.lane.b32.xlu1 %v3750_v25, %s4434_s12 }
 0x278   : > { %v3872_v9 = vpop.permute.xlu2 %1302  ;;  %v3874_v10 = vpop.permute.xlu0 %1348 }
 0x279   : > { %v3876_v13 = vpop.permute.xlu1 %1300 }
 0x27e   : > { %1312 = vrot.lane.b32.xlu2 %v3781_v7, %s3131_s24  ;;  %1206 = vrot.lane.b32.xlu0 %v3742_v16, %s4435_s11  ;;  %s4436_s24 = sshll.u32 %s3294_s1, 6 }
 0x27f   : > { %1266 = vrot.lane.b32.xlu1 %v3781_v7, %s3132_s28  ;;  %s4310_s22 = scalar_lea.vmem [#allocation8], %s4436_s24 }
 0x280   : > { %v3884_v14 = vpop.permute.xlu2 %1404  ;;  %v3886_v15 = vpop.permute.xlu0 %1450  ;;  %s2319_s17 = sshll.u32 %s4310_s22, 4  ;;  %s2320_s17 = int_to_ptr.vmem [resolvable:$true] %s2319_s17 }
 0x281   : > { %v3888_v61 = vpop.permute.xlu1 %1402 }
 0x286   : > { %1536 = vrot.lane.b32.xlu2 %v3742_v16, %s4434_s12  ;;  %1550 = vrot.lane.b32.xlu0 %v3781_v7, %s4434_s12  ;;  %v3906_v16 = vperm.slane %v1468_v19, 0 }
 0x287   : > { %1220 = vrot.lane.b32.xlu1 %v3781_v7, %s4435_s11  ;;  %v1422_v7 = vld [vmem:[#allocation6 + $0x5] ss:$8 sm:$0x3] }
 0x288   : > { %v3896_v62 = vpop.permute.xlu2 %1258  ;;  %v3898_v18 = vpop.permute.xlu0 %1304 }
 0x289   : > { %v3900_v17 = vpop.permute.xlu1 %1256 }
 0x28e   : > { %1546 = vrot.lane.b32.xlu2 %v3762_v35, %s4434_s12  ;;  %1216 = vrot.lane.b32.xlu0 %v3762_v35, %s4435_s11 }
 0x28f   : > { %1208 = vrot.lane.b32.xlu1 %v3760_v33, %s4435_s11 }
 0x290   : > { %v1453_v12 = vpop.permute.xlu2 %1452  ;;  %v1499_v8 = vpop.permute.xlu0 %1498 }
 0x291   : > { %v3916_v27 = vpop.permute.xlu1 %1496  ;;  %v1460_v28 = vsel %vm671_vm6, %v1445_v55, %v1453_v12  ;;  %v1464_v29 = vsel %vm671_vm6, %v1453_v12, %v1445_v55  ;;  %v1506_v30 = vsel %vm719_vm5, %v1491_v41, %v1499_v8  ;;  %v1510_v21 = vsel %vm719_vm5, %v1499_v8, %v1491_v41  ;;  %v1627_v41 = vld [vmem:[%s4404_s5 + $0x8] sm:$0xff] }
 0x292   : > { %v1474_v32 = vmul.f32 %v3906_v16, %v1460_v28  ;;  %v1475_v33 = vmul.f32 %v3908_v22, %v1464_v29  ;;  %v1520_v34 = vmul.f32 %v3910_v23, %v1506_v30  ;;  %v1521_v35 = vmul.f32 %v3912_v54, %v1510_v21 }
 0x294   : > { %v1482_v44 = vpack.c.bf16 %v1475_v33, %v1474_v32  ;;  %v1528_v46 = vpack.c.bf16 %v1521_v35, %v1520_v34 }
 0x296   : > { %1486 = vst [vmem:[#allocation2 + $0xc0] sm:$0xff] %v1482_v44  ;;  %1214 = vrot.lane.b32.xlu2 %v3750_v25, %s4435_s11  ;;  %1632 = vperm.xlu0 %2962, %v1626_v36   ;;  %v2029_v44 = vld [vmem:[%s4408_s9 + $0x8] sm:$0xff]  ;;  %s3075_s11 = scalar_lea.hbm %s4409_s10, 128 }
 0x297   : > { %1532 = vst [vmem:[#allocation2 + $0xe0] sm:$0xff] %v1528_v46  ;;  %1642 = vperm.xlu1 %2960, %v1628_v47   ;;  %p3077_p9 = scmp.lt.s32.totalorder %s3075_s11, %s3071_s19 }
 0x298   : > { %v1307_v43 = vpop.permute.xlu2 %1306  ;;  %v1353_v1 = vpop.permute.xlu0 %1352 }
 0x299   : > { %v3946_v24 = vpop.permute.xlu1 %1350  ;;  %v1314_v38 = vsel %vm519_vm1, %v3852_v57, %v1307_v43  ;;  %v1318_v25 = vsel %vm519_vm1, %v1307_v43, %v3852_v57  ;;  %v1360_v48 = vsel %vm567_vm0, %v3854_v58, %v1353_v1  ;;  %v1364_v49 = vsel %vm567_vm0, %v1353_v1, %v3854_v58  ;;  %p3078_p2 = por %p3077_p9, %p3076_p11 }
 0x29a   : > { %v1328_v51 = vmul.f32 %v3938_v31, %v1318_v25  ;;  %v1329_v3 = vmul.f32 %v3940_v37, %v1314_v38  ;;  %v1374_v2 = vmul.f32 %v3942_v45, %v1364_v49  ;;  %v1375_v4 = vmul.f32 %v3944_v0, %v1360_v48 }
 0x29b   : > { %v3973_v57 = vperm.slane %v1422_v7, 0  ;;  %v3975_v58 = vperm.slane %v1422_v7, 1  ;;  %p3079_p10 = pnand %p3078_p2, %p3074_p8 }
 0x29c   : > { %v1336_v52 = vpack.c.bf16 %v1329_v3, %v1328_v51  ;;  %v1382_v55 = vpack.c.bf16 %v1375_v4, %v1374_v2 }
 0x29e   : > { %1340 = vst [vmem:[#allocation2 + $0x40] sm:$0xff] %v1336_v52  ;;  %1647 = vperm.xlu2 %2961, %v1629_v5   ;;  %2034 = vperm.xlu0 %2962, %v2028_v6   ;;  %v2030_v52 = vld [vmem:[%s4408_s9 + $0x10] sm:$0xff] }
 0x29f   : > { %1386 = vst [vmem:[#allocation2 + $0x60] sm:$0xff] %v1382_v55  ;;  %1637 = vperm.xlu1 %2960, %v1627_v41  }
 0x2a0   : > { %v1409_v19 = vpop.permute.xlu2 %1408  ;;  %v1455_v20 = vpop.permute.xlu0 %1454 }
 0x2a1   : > { %v1407_v12 = vpop.permute.xlu1 %1406  ;;  %v1415_v8 = vsel %vm623_vm8, %v3863_v60, %v1409_v19  ;;  %v1419_v28 = vsel %vm623_vm8, %v1409_v19, %v3863_v60  ;;  %v1461_v29 = vsel %vm671_vm6, %v3865_v63, %v1455_v20  ;;  %v1465_v30 = vsel %vm671_vm6, %v1455_v20, %v3865_v63 }
 0x2a2   : > { %v1414_v21 = vsel %vm623_vm8, %v3823_v53, %v1407_v12  ;;  %v1418_v32 = vsel %vm623_vm8, %v1407_v12, %v3823_v53  ;;  %v1430_v33 = vmul.f32 %v3973_v57, %v1415_v8  ;;  %v1431_v60 = vmul.f32 %v3975_v58, %v1419_v28  ;;  %v2031_v53 = vld [vmem:[%s4408_s9 + $0x18] sm:$0xff] }
 0x2a3   : > { %v1428_v34 = vmul.f32 %v3973_v57, %v1414_v21  ;;  %v1429_v35 = vmul.f32 %v3975_v58, %v1418_v32  ;;  %v1476_v36 = vmul.f32 %v3906_v16, %v1461_v29  ;;  %v1477_v63 = vmul.f32 %v3908_v22, %v1465_v30 }
 0x2a4   : > { %v1437_v40 = vpack.c.bf16 %v1431_v60, %v1430_v33 }
 0x2a5   : > { %v1436_v46 = vpack.c.bf16 %v1429_v35, %v1428_v34  ;;  %v1483_v47 = vpack.c.bf16 %v1477_v63, %v1476_v36  ;;  %v1276_v63 = vld [vmem:[#allocation6 + $0x1] ss:$8 sm:$0x3] }
 0x2a6   : > { %1441 = vst [vmem:[#allocation2 + $0xa8] sm:$0xff] %v1437_v40  ;;  %1988 = vperm.xlu2 %2961, %v1985_v39   ;;  %2049 = vperm.xlu0 %2962, %v2031_v53   ;;  %v4061_v40 = vperm.slane %v1276_v63, 0 }
 0x2a7   : > { %1440 = vst [vmem:[#allocation2 + $0xa0] sm:$0xff] %v1436_v46  ;;  %2039 = vperm.xlu1 %2960, %v2029_v44  }
 0x2a8   : > { %1487 = vst [vmem:[#allocation2 + $0xc8] sm:$0xff] %v1483_v47  ;;  %v1503_v43 = vpop.permute.xlu2 %1502  ;;  %v1309_v1 = vpop.permute.xlu0 %1308 }
 0x2a9   : > { %v1501_v38 = vpop.permute.xlu1 %1500  ;;  %v1508_v25 = vsel %vm719_vm5, %v3850_v56, %v1503_v43  ;;  %v1512_v48 = vsel %vm719_vm5, %v1503_v43, %v3850_v56  ;;  %v1315_v49 = vsel %vm519_vm1, %v3876_v13, %v1309_v1  ;;  %v1319_v51 = vsel %vm519_vm1, %v1309_v1, %v3876_v13 }
 0x2aa   : > { %v1507_v3 = vsel %vm719_vm5, %v3836_v26, %v1501_v38  ;;  %v1511_v2 = vsel %vm719_vm5, %v1501_v38, %v3836_v26  ;;  %v1524_v4 = vmul.f32 %v3910_v23, %v1508_v25  ;;  %v1525_v56 = vmul.f32 %v3912_v54, %v1512_v48 }
 0x2ab   : > { %v1522_v5 = vmul.f32 %v3910_v23, %v1507_v3  ;;  %v1523_v6 = vmul.f32 %v3912_v54, %v1511_v2  ;;  %v1330_v7 = vmul.f32 %v3938_v31, %v1319_v51  ;;  %v1331_v13 = vmul.f32 %v3940_v37, %v1315_v49 }
 0x2ac   : > { %v1530_v55 = vpack.c.bf16 %v1525_v56, %v1524_v4 }
 0x2ad   : > { %v1529_v41 = vpack.c.bf16 %v1523_v6, %v1522_v5  ;;  %v1337_v19 = vpack.c.bf16 %v1331_v13, %v1330_v7 }
 0x2ae   : > { %1534 = vst [vmem:[#allocation2 + $0xf0] sm:$0xff] %v1530_v55  ;;  %2044 = vperm.xlu2 %2961, %v2030_v52  }
 0x2af   : > { %1533 = vst [vmem:[#allocation2 + $0xe8] sm:$0xff] %v1529_v41 }
 0x2b0   : > { %1341 = vst [vmem:[#allocation2 + $0x48] sm:$0xff] %v1337_v19  ;;  %v1357_v26 = vpop.permute.xlu2 %1356  ;;  %v1411_v20 = vpop.permute.xlu0 %1410 }
 0x2b1   : > { %v1355_v12 = vpop.permute.xlu1 %1354  ;;  %v1362_v8 = vsel %vm567_vm0, %v3874_v10, %v1357_v26  ;;  %v1366_v28 = vsel %vm567_vm0, %v1357_v26, %v3874_v10  ;;  %v1416_v29 = vsel %vm623_vm8, %v3888_v61, %v1411_v20  ;;  %v1420_v30 = vsel %vm623_vm8, %v1411_v20, %v3888_v61 }
 0x2b2   : > { %v1361_v21 = vsel %vm567_vm0, %v3844_v50, %v1355_v12  ;;  %v1365_v32 = vsel %vm567_vm0, %v1355_v12, %v3844_v50  ;;  %v1378_v33 = vmul.f32 %v3942_v45, %v1366_v28  ;;  %v1379_v10 = vmul.f32 %v3944_v0, %v1362_v8 }
 0x2b3   : > { %v1376_v60 = vmul.f32 %v3942_v45, %v1365_v32  ;;  %v1377_v34 = vmul.f32 %v3944_v0, %v1361_v21  ;;  %v1432_v35 = vmul.f32 %v3973_v57, %v1416_v29  ;;  %v1433_v61 = vmul.f32 %v3975_v58, %v1420_v30 }
 0x2b4   : > { %v1384_v36 = vpack.c.bf16 %v1379_v10, %v1378_v33  ;;  %v4063_v50 = vperm.slane %v1276_v63, 1 }
 0x2b5   : > { %v1383_v39 = vpack.c.bf16 %v1377_v34, %v1376_v60  ;;  %v1438_v53 = vpack.c.bf16 %v1433_v61, %v1432_v35  ;;  %v1560_v60 = vld [vmem:[#allocation6 + $0x10] ss:$8 sm:$0x3] }
 0x2b6   : > { %1388 = vst [vmem:[#allocation2 + $0x70] sm:$0xff] %v1384_v36  ;;  %v2734_v61 = vld [vmem:[#allocation2 + $0xf0] sm:$0xf] }
 0x2b7   : > { %1387 = vst [vmem:[#allocation2 + $0x68] sm:$0xff] %v1383_v39  ;;  %v4119_v39 = vperm.slane %v1560_v60, 0 }
 0x2b8   : > { %1442 = vst [vmem:[#allocation2 + $0xb0] sm:$0xff] %v1438_v53  ;;  %v1459_v44 = vpop.permute.xlu2 %1458  ;;  %v1265_v46 = vpop.permute.xlu0 %1264  ;;  %v4121_v53 = vperm.slane %v1560_v60, 1 }
 0x2b9   : > { %v1457_v47 = vpop.permute.xlu1 %1456  ;;  %v1463_v43 = vsel %vm671_vm6, %v3886_v15, %v1459_v44  ;;  %v1467_v1 = vsel %vm671_vm6, %v1459_v44, %v3886_v15  ;;  %v1270_v38 = vsel %vm471_vm2, %v3900_v17, %v1265_v46  ;;  %v1274_v25 = vsel %vm471_vm2, %v1265_v46, %v3900_v17 }
 0x2ba   : > { %v1462_v48 = vsel %vm671_vm6, %v3861_v59, %v1457_v47  ;;  %v1466_v49 = vsel %vm671_vm6, %v1457_v47, %v3861_v59  ;;  %v1480_v51 = vmul.f32 %v3906_v16, %v1463_v43  ;;  %v1481_v15 = vmul.f32 %v3908_v22, %v1467_v1  ;;  %v2726_v47 = vld [vmem:[#allocation2 + $0xe0] sm:$0xf] }
 0x2bb   : > { %v1478_v3 = vmul.f32 %v3906_v16, %v1462_v48  ;;  %v1479_v2 = vmul.f32 %v3908_v22, %v1466_v49  ;;  %v1286_v4 = vmul.f32 %v4061_v40, %v1274_v25  ;;  %v1287_v17 = vmul.f32 %v4063_v50, %v1270_v38 }
 0x2bc   : > { %v1485_v56 = vpack.c.bf16 %v1481_v15, %v1480_v51 }
 0x2bd   : > { %v1484_v5 = vpack.c.bf16 %v1479_v2, %v1478_v3  ;;  %v1292_v6 = vpack.c.bf16 %v1287_v17, %v1286_v4 }
 0x2be   : > { %1489 = vst [vmem:[#allocation2 + $0xd8] sm:$0xff] %v1485_v56 }
 0x2bf   : > { %1488 = vst [vmem:[#allocation2 + $0xd0] sm:$0xff] %v1484_v5 }
 0x2c0   : > { %1296 = vst [vmem:[#allocation2 + $0x30] sm:$0xff] %v1292_v6  ;;  %v1263_v7 = vpop.permute.xlu2 %1262  ;;  %v1505_v59 = vpop.permute.xlu0 %1504 }
 0x2c1   : > { %v1311_v13 = vpop.permute.xlu1 %1310  ;;  %v1509_v52 = vsel %vm719_vm5, %v3916_v27, %v1505_v59  ;;  %v1513_v16 = vsel %vm719_vm5, %v1505_v59, %v3916_v27 }
 0x2c2   : > { %v1316_v22 = vsel %vm519_vm1, %v3872_v9, %v1311_v13  ;;  %v1320_v55 = vsel %vm519_vm1, %v1311_v13, %v3872_v9  ;;  %v1526_v41 = vmul.f32 %v3910_v23, %v1509_v52  ;;  %v1527_v19 = vmul.f32 %v3912_v54, %v1513_v16  ;;  %v2710_v52 = vld [vmem:[#allocation2 + $0xc0] sm:$0xf] }
 0x2c3   : > { %v1332_v26 = vmul.f32 %v3938_v31, %v1320_v55  ;;  %v1333_v20 = vmul.f32 %v3940_v37, %v1316_v22 }
 0x2c4   : > { %v1531_v12 = vpack.c.bf16 %v1527_v19, %v1526_v41  ;;  %v1230_v19 = vld [vmem:[#allocation6] ss:$8 sm:$0x3] }
 0x2c5   : > { %v1338_v8 = vpack.c.bf16 %v1333_v20, %v1332_v26  ;;  %v2863_v17 = vld [vmem:[#allocation2 + $0xd4] sm:$0xf0]  ;;  %v2702_v26 = vld [vmem:[#allocation2 + $0xb0] sm:$0xf] }
 0x2c6   : > { %1535 = vst [vmem:[#allocation2 + $0xf8] sm:$0xff] %v1531_v12  ;;  %v2718_v4 = vld [vmem:[#allocation2 + $0xd0] sm:$0xf]  ;;  %v4149_v12 = vperm.slane %v1230_v19, 0 }
 0x2c7   : > { %1342 = vst [vmem:[#allocation2 + $0x50] sm:$0xff] %v1338_v8  ;;  %v2719_v6 = vor.u32 %v2863_v17, %v2718_v4  ;;  %v4151_v8 = vperm.slane %v1230_v19, 1  ;;  %v2670_v17 = vld [vmem:[#allocation2 + $0x70] sm:$0xf] }
 0x2c8   : > { %v1549_v27 = vpop.permute.xlu2 %1548  ;;  %v1255_v28 = vpop.permute.xlu0 %1254 }
 0x2c9   : > { %v1261_v29 = vpop.permute.xlu1 %1260  ;;  %v1269_v30 = vsel %vm471_vm2, %v1255_v28, %v1263_v7  ;;  %v1273_v9 = vsel %vm471_vm2, %v1263_v7, %v1255_v28  ;;  %v2861_v7 = vld [vmem:[#allocation2 + $0xc4] sm:$0xf0] }
 0x2ca   : > { %v1268_v23 = vsel %vm471_vm2, %v3829_v42, %v1261_v29  ;;  %v1272_v54 = vsel %vm471_vm2, %v1261_v29, %v3829_v42  ;;  %v1284_v21 = vmul.f32 %v4061_v40, %v1273_v9  ;;  %v1285_v32 = vmul.f32 %v4063_v50, %v1269_v30  ;;  %v2865_v42 = vld [vmem:[#allocation2 + $0xe4] sm:$0xf0] }
 0x2cb   : > { %v1282_v33 = vmul.f32 %v4061_v40, %v1272_v54  ;;  %v1283_v10 = vmul.f32 %v4063_v50, %v1268_v23  ;;  %v2727_v25 = vor.u32 %v2865_v42, %v2726_v47  ;;  %v2711_v55 = vor.u32 %v2861_v7, %v2710_v52  ;;  %v2857_v30 = vld [vmem:[#allocation2 + $0xa4] sm:$0xf0]  ;;  %v2664_v52 = vld [vmem:[#allocation2 + $0x68] sm:$0xf0] }
 0x2cc   : > { %v1291_v34 = vpack.c.bf16 %v1285_v32, %v1284_v21 }
 0x2cd   : > { %v1290_v35 = vpack.c.bf16 %v1283_v10, %v1282_v33  ;;  %v2867_v36 = vld [vmem:[#allocation2 + $0xf4] sm:$0xf0] }
 0x2ce   : > { %1295 = vst [vmem:[#allocation2 + $0x28] sm:$0xff] %v1291_v34  ;;  %v2735_v63 = vor.u32 %v2867_v36, %v2734_v61 }
 0x2cf   : > { %1294 = vst [vmem:[#allocation2 + $0x20] sm:$0xff] %v1290_v35  ;;  %v2855_v35 = vld [vmem:[#allocation2 + $0x94] sm:$0xf0] }
 0x2d0   : > { %v4123_v44 = vpop.permute.xlu2 %1212  ;;  %1885 = vmatpush.bf16.msrb.mxu3 %v2735_v63  ;;  %v1541_v46 = vpop.permute.xlu0 %1540 }
 0x2d1   : > { %v1413_v43 = vpop.permute.xlu1 %1412  ;;  %v1554_v1 = vsel %vm767_vm3, %v1541_v46, %v1549_v27  ;;  %v1558_v38 = vsel %vm767_vm3, %v1549_v27, %v1541_v46  ;;  %v2853_v46 = vld [vmem:[#allocation2 + $0x84] sm:$0xf0] }
 0x2d2   : > { %v1417_v48 = vsel %vm623_vm8, %v3884_v14, %v1413_v43  ;;  %v1421_v49 = vsel %vm623_vm8, %v1413_v43, %v3884_v14  ;;  %v1570_v51 = vmul.f32 %v4119_v39, %v1554_v1  ;;  %v1571_v15 = vmul.f32 %v4121_v53, %v1558_v38 }
 0x2d3   : > { %v1434_v3 = vmul.f32 %v3973_v57, %v1417_v48  ;;  %v1435_v2 = vmul.f32 %v3975_v58, %v1421_v49  ;;  %v2678_v48 = vld [vmem:[#allocation2 + $0x80] sm:$0xf] }
 0x2d4   : > { %v1576_v56 = vpack.c.bf16 %v1571_v15, %v1570_v51  ;;  %1886 = vmatpush.bf16.msrb.mxu3 %v2727_v25  ;;  %v2679_v15 = vor.u32 %v2853_v46, %v2678_v48  ;;  %v2604_v48 = vld [vmem:[%s4403_s4 + $0x24] sm:$0xf0] }
 0x2d5   : > { %v1439_v5 = vpack.c.bf16 %v1435_v2, %v1434_v3  ;;  %v2830_v3 = vld [vmem:[%s4403_s4 + $0x4] sm:$0xf]  ;;  %v2592_v2 = vld [vmem:[%s4403_s4 + $0xc] sm:$0xf0] }
 0x2d6   : > { %1580 = vst [vmem:[#allocation2 + $0x110] sm:$0xff] %v1576_v56 }
 0x2d7   : > { %1443 = vst [vmem:[#allocation2 + $0xb8] sm:$0xff] %v1439_v5 }
 0x2d8   : > { %v1313_v59 = vpop.permute.xlu2 %1312  ;;  %1887 = vmatpush.bf16.msrb.mxu3 %v2719_v6  ;;  %v1219_v14 = vpop.permute.xlu0 %1218  ;;  %v2850_v6 = vld [vmem:[#allocation2 + $0x74] sm:$0xf] }
 0x2d9   : > { %v4139_v13 = vpop.permute.xlu1 %1542  ;;  %v1317_v57 = vsel %vm519_vm1, %v3898_v18, %v1313_v59  ;;  %v1321_v58 = vsel %vm519_vm1, %v1313_v59, %v3898_v18  ;;  %v2694_v18 = vld [vmem:[#allocation2 + $0xa0] sm:$0xf] }
 0x2da   : > { %v1334_v16 = vmul.f32 %v3938_v31, %v1321_v58  ;;  %v1335_v22 = vmul.f32 %v3940_v37, %v1317_v57  ;;  %v2695_v60 = vor.u32 %v2857_v30, %v2694_v18  ;;  %v4185_v57 = vor.u32 %v2830_v3, %v2592_v2  ;;  %v2849_v58 = vld [vmem:[#allocation2 + $0x64] sm:$0xf0] }
 0x2dc   : > { %v1339_v41 = vpack.c.bf16 %v1335_v22, %v1334_v16  ;;  %1888 = vmatpush.bf16.msrb.mxu3 %v2711_v55  ;;  %v2662_v55 = vld [vmem:[#allocation2 + $0x60] sm:$0xf] }
 0x2de   : > { %1343 = vst [vmem:[#allocation2 + $0x58] sm:$0xff] %v1339_v41  ;;  %v2859_v20 = vld [vmem:[#allocation2 + $0xb4] sm:$0xf0]  ;;  %v2848_v41 = vld [vmem:[#allocation2 + $0x64] sm:$0xf] }
 0x2df   : > { %v2703_v27 = vor.u32 %v2859_v20, %v2702_v26 }
 0x2e0   : > { %v1537_v28 = vpop.permute.xlu2 %1536  ;;  %v1359_v29 = vpop.permute.xlu0 %1358 }
 0x2e1   : > { %v1211_v9 = vpop.permute.xlu1 %1210  ;;  %1889 = vmatpush.bf16.msrb.mxu3 %v2703_v27  ;;  %v1363_v31 = vsel %vm567_vm0, %v3946_v24, %v1359_v29  ;;  %v1367_v37 = vsel %vm567_vm0, %v1359_v29, %v3946_v24  ;;  %v2686_v24 = vld [vmem:[#allocation2 + $0x90] sm:$0xf]  ;;  %v2663_v27 = vor.u32 %v2849_v58, %v2662_v55 }
 0x2e2   : > { %v1224_v23 = vsel %vm424_vm4, %v1211_v9, %v1219_v14  ;;  %v1228_v54 = vsel %vm424_vm4, %v1219_v14, %v1211_v9  ;;  %v1380_v21 = vmul.f32 %v3942_v45, %v1367_v37  ;;  %v1381_v32 = vmul.f32 %v3944_v0, %v1363_v31 }
 0x2e3   : > { %v1240_v33 = vmul.f32 %v4149_v12, %v1228_v54  ;;  %v1241_v10 = vmul.f32 %v4151_v8, %v1224_v23  ;;  %v2687_v36 = vor.u32 %v2855_v35, %v2686_v24  ;;  %v2648_v35 = vld [vmem:[#allocation2 + $0x48] sm:$0xf0] }
 0x2e4   : > { %v1385_v34 = vpack.c.bf16 %v1381_v32, %v1380_v21 }
 0x2e5   : > { %v1246_v61 = vpack.c.bf16 %v1241_v10, %v1240_v33  ;;  %1890 = vmatpush.bf16.msrb.mxu3 %v2695_v60  ;;  %v2847_v23 = vld [vmem:[#allocation2 + $0x54] sm:$0xf0]  ;;  %v2656_v54 = vld [vmem:[#allocation2 + $0x58] sm:$0xf0]  ;;  %v2654_v33 = vld [vmem:[#allocation2 + $0x50] sm:$0xf] }
 0x2e6   : > { %1389 = vst [vmem:[#allocation2 + $0x78] sm:$0xff] %v1385_v34  ;;  %v2846_v10 = vld [vmem:[#allocation2 + $0x54] sm:$0xf]  ;;  %v2845_v34 = vld [vmem:[#allocation2 + $0x44] sm:$0xf0] }
 0x2e7   : > { %1250 = vst [vmem:[#allocation2 + $0x10] sm:$0xff] %v1246_v61  ;;  %v2659_v60 = vor.u32 %v2846_v10, %v2656_v54  ;;  %v2646_v61 = vld [vmem:[#allocation2 + $0x40] sm:$0xf]  ;;  %v2831_v10 = vld [vmem:[%s4403_s4 + $0x8] sm:$0xf0] }
 0x2e8   : > { %v1547_v63 = vpop.permute.xlu2 %1546  ;;  %v1539_v42 = vpop.permute.xlu0 %1538 }
 0x2e9   : > { %v1545_v47 = vpop.permute.xlu1 %1544  ;;  %1891 = vmatpush.bf16.msrb.mxu3 %v2687_v36  ;;  %v1553_v45 = vsel %vm767_vm3, %v1539_v42, %v1547_v63  ;;  %v1557_v0 = vsel %vm767_vm3, %v1547_v63, %v1539_v42  ;;  %v2647_v42 = vor.u32 %v2845_v34, %v2646_v61 }
 0x2ea   : > { %v1552_v43 = vsel %vm767_vm3, %v1537_v28, %v1545_v47  ;;  %v1556_v1 = vsel %vm767_vm3, %v1545_v47, %v1537_v28  ;;  %v1568_v38 = vmul.f32 %v4119_v39, %v1553_v45  ;;  %v1569_v25 = vmul.f32 %v4121_v53, %v1557_v0 }
 0x2eb   : > { %v1566_v49 = vmul.f32 %v4119_v39, %v1552_v43  ;;  %v1567_v51 = vmul.f32 %v4121_v53, %v1556_v1  ;;  %v2667_v28 = vor.u32 %v2848_v41, %v2664_v52 }
 0x2ec   : > { %v1575_v4 = vpack.c.bf16 %v1569_v25, %v1568_v38  ;;  %v2833_v25 = vld [vmem:[%s4403_s4 + $0x1c] sm:$0xf] }
 0x2ed   : > { %v1574_v56 = vpack.c.bf16 %v1567_v51, %v1566_v49  ;;  %1892 = vmatpush.bf16.msrb.mxu3 %v2679_v15  ;;  %v2851_v5 = vld [vmem:[#allocation2 + $0x74] sm:$0xf0]  ;;  %v2672_v7 = vld [vmem:[#allocation2 + $0x78] sm:$0xf0]  ;;  %v2842_v49 = vld [vmem:[#allocation2 + $0x34] sm:$0xf]  ;;  %v4224_v2 = vor.u32 %v2833_v25, %v2604_v48 }
 0x2ee   : > { %1579 = vst [vmem:[#allocation2 + $0x108] sm:$0xff] %v1575_v4  ;;  %v2671_v59 = vor.u32 %v2851_v5, %v2670_v17  ;;  %v2675_v14 = vor.u32 %v2850_v6, %v2672_v7  ;;  %v2841_v4 = vld [vmem:[#allocation2 + $0x24] sm:$0xf0]  ;;  %v2840_v5 = vld [vmem:[#allocation2 + $0x24] sm:$0xf] }
 0x2ef   : > { %1578 = vst [vmem:[#allocation2 + $0x100] sm:$0xff] %v1574_v56  ;;  %v2630_v56 = vld [vmem:[#allocation2 + $0x20] sm:$0xf]  ;;  %v2632_v6 = vld [vmem:[#allocation2 + $0x28] sm:$0xf0] }
 0x2f0   : > { %v1215_v16 = vpop.permute.xlu2 %1214  ;;  %1866 = vmatpush.bf16.msrb.mxu1 %v2671_v59  ;;  %1923 = vmatpush.bf16.msra.mxu0 %v2675_v14  ;;  %v1207_v22 = vpop.permute.xlu0 %1206  ;;  %v2622_v41 = vld [vmem:[#allocation2 + $0x10] sm:$0xf]  ;;  %v2838_v11 = vld [vmem:[#allocation2 + $0x14] sm:$0xf] }
 0x2f1   : > { %v1267_v19 = vpop.permute.xlu1 %1266  ;;  %v1222_v26 = vsel %vm424_vm4, %v1207_v22, %v1215_v16  ;;  %v1226_v20 = vsel %vm424_vm4, %v1215_v16, %v1207_v22  ;;  %2875 = vmatpush.bf16.msra.mxu3 %v2675_v14  ;;  %v2631_v16 = vor.u32 %v2841_v4, %v2630_v56  ;;  %v2635_v22 = vor.u32 %v2840_v5, %v2632_v6  ;;  %v2856_v56 = vld [vmem:[#allocation2 + $0xa4] sm:$0xf]  ;;  %v2696_v5 = vld [vmem:[#allocation2 + $0xa8] sm:$0xf0] }
 0x2f2   : > { %v1271_v29 = vsel %vm471_vm2, %v3896_v62, %v1267_v19  ;;  %v1275_v18 = vsel %vm471_vm2, %v1267_v19, %v3896_v62  ;;  %v1236_v30 = vmul.f32 %v4149_v12, %v1226_v20  ;;  %v1237_v9 = vmul.f32 %v4151_v8, %v1222_v26  ;;  %1893 = vmatmul.bf16.vlgmr.msrb.gmra.mxu3 %v4185_v57  ;;  %v2750_v19 = vld [vmem:[#allocation2 + $0x110] sm:$0xf] }
 0x2f3   : > { %v1288_v31 = vmul.f32 %v4061_v40, %v1275_v18  ;;  %v1289_v37 = vmul.f32 %v4063_v50, %v1271_v29  ;;  %v2655_v62 = vor.u32 %v2847_v23, %v2654_v33  ;;  %v2844_v50 = vld [vmem:[#allocation2 + $0x44] sm:$0xf]  ;;  %v2866_v23 = vld [vmem:[#allocation2 + $0xf4] sm:$0xf]  ;;  %v2590_v33 = vld [vmem:[%s4403_s4] sm:$0xf]  ;;  %v2699_v6 = vor.u32 %v2856_v56, %v2696_v5 }
 0x2f4   : > { %v1244_v21 = vpack.c.bf16 %v1237_v9, %v1236_v30  ;;  %1867 = vmatpush.bf16.msrb.mxu1 %v2663_v27  ;;  %1924 = vmatpush.bf16.msra.mxu0 %v2667_v28  ;;  %v2651_v46 = vor.u32 %v2844_v50, %v2648_v35  ;;  %v2736_v30 = vld [vmem:[#allocation2 + $0xf8] sm:$0xf0]  ;;  %v2598_v9 = vld [vmem:[%s4403_s4 + $0x8] sm:$0xf]  ;;  %v2834_v35 = vld [vmem:[%s4403_s4 + $0x20] sm:$0xf0] }
 0x2f5   : > { %v1293_v32 = vpack.c.bf16 %v1289_v37, %v1288_v31  ;;  %2876 = vmatpush.bf16.msra.mxu3 %v2667_v28  ;;  %v2832_v31 = vld [vmem:[%s4403_s4 + $0x10] sm:$0xf0]  ;;  %v2739_v54 = vor.u32 %v2866_v23, %v2736_v30 }
 0x2f6   : > { %1248 = vst [vmem:[#allocation2] sm:$0xff] %v1244_v21  ;;  %v2742_v18 = vld [vmem:[#allocation2 + $0x100] sm:$0xf]  ;;  %v2599_v21 = vor.u32 %v2832_v31, %v2598_v9 }
 0x2f7   : > { %1297 = vst [vmem:[#allocation2 + $0x38] sm:$0xff] %v1293_v32  ;;  %v2728_v32 = vld [vmem:[#allocation2 + $0xe8] sm:$0xf0] }
 0x2f8   : > { %1868 = vmatpush.bf16.msrb.mxu1 %v2655_v62  ;;  %1925 = vmatpush.bf16.msra.mxu0 %v2659_v60  ;;  %v1551_v40 = vpop.permute.xlu0 %1550  ;;  %v2602_v62 = vld [vmem:[%s4403_s4 + $0x18] sm:$0xf] }
 0x2f9   : > { %v1221_v24 = vpop.permute.xlu1 %1220  ;;  %v1555_v36 = vsel %vm767_vm3, %v4139_v13, %v1551_v40  ;;  %v1559_v63 = vsel %vm767_vm3, %v1551_v40, %v4139_v13  ;;  %2877 = vmatpush.bf16.msra.mxu3 %v2659_v60 }
 0x2fa   : > { %v1225_v47 = vsel %vm424_vm4, %v4123_v44, %v1221_v24  ;;  %v1229_v45 = vsel %vm424_vm4, %v1221_v24, %v4123_v44  ;;  %v1572_v0 = vmul.f32 %v4119_v39, %v1555_v36  ;;  %v1573_v43 = vmul.f32 %v4121_v53, %v1559_v63  ;;  %v2638_v39 = vld [vmem:[#allocation2 + $0x30] sm:$0xf]  ;;  %v2864_v63 = vld [vmem:[#allocation2 + $0xe4] sm:$0xf] }
 0x2fb   : > { %v1242_v1 = vmul.f32 %v4149_v12, %v1229_v45  ;;  %v1243_v38 = vmul.f32 %v4151_v8, %v1225_v47  ;;  %v2731_v47 = vor.u32 %v2864_v63, %v2728_v32 }
 0x2fc   : > { %v1577_v13 = vpack.c.bf16 %v1573_v43, %v1572_v0  ;;  %1869 = vmatpush.bf16.msrb.mxu1 %v2647_v42  ;;  %1926 = vmatpush.bf16.msra.mxu0 %v2651_v46  ;;  %v2870_v42 = vld [vmem:[#allocation2 + $0x114] sm:$0xf]  ;;  %v2603_v0 = vor.u32 %v2834_v35, %v2602_v62  ;;  %v2720_v43 = vld [vmem:[#allocation2 + $0xd8] sm:$0xf0] }
 0x2fd   : > { %v1247_v44 = vpack.c.bf16 %v1243_v38, %v1242_v1  ;;  %2878 = vmatpush.bf16.msra.mxu3 %v2651_v46  ;;  %v2614_v60 = vld [vmem:[#allocation2] sm:$0xf]  ;;  %v2836_v34 = vld [vmem:[#allocation2 + $0x4] sm:$0xf]  ;;  %v2591_v46 = vor.u32 %v2831_v10, %v2590_v33  ;;  %v2862_v1 = vld [vmem:[#allocation2 + $0xd4] sm:$0xf] }
 0x2fe   : > { %1581 = vst [vmem:[#allocation2 + $0x118] sm:$0xff] %v1577_v13  ;;  %v2843_v53 = vld [vmem:[#allocation2 + $0x34] sm:$0xf0]  ;;  %v2640_v51 = vld [vmem:[#allocation2 + $0x38] sm:$0xf0]  ;;  %v2723_v25 = vor.u32 %v2862_v1, %v2720_v43 }
 0x2ff   : > { %1251 = vst [vmem:[#allocation2 + $0x18] sm:$0xff] %v1247_v44  ;;  %v2639_v15 = vor.u32 %v2843_v53, %v2638_v39  ;;  %v2643_v3 = vor.u32 %v2842_v49, %v2640_v51  ;;  %v2868_v38 = vld [vmem:[#allocation2 + $0x104] sm:$0xf]  ;;  %v2744_v13 = vld [vmem:[#allocation2 + $0x108] sm:$0xf0] }
 0x300   : > { %v1217_v17 = vpop.permute.xlu0 %1216  ;;  %v2747_v48 = vor.u32 %v2868_v38, %v2744_v13  ;;  %v2712_v44 = vld [vmem:[#allocation2 + $0xc8] sm:$0xf0]  ;;  %v2860_v39 = vld [vmem:[#allocation2 + $0xc4] sm:$0xf]  ;;  %v2610_v53 = vld [vmem:[%s4403_s4 + $0x20] sm:$0xf] }
 0x301   : > { %v1209_v7 = vpop.permute.xlu1 %1208  ;;  %1870 = vmatpush.bf16.msrb.mxu1 %v2639_v15  ;;  %1927 = vmatpush.bf16.msra.mxu0 %v2643_v3  ;;  %v2715_v49 = vor.u32 %v2860_v39, %v2712_v44  ;;  %v2835_v51 = vld [vmem:[%s4403_s4 + $0x28] sm:$0xf0]  ;;  %v2704_v15 = vld [vmem:[#allocation2 + $0xb8] sm:$0xf0] }
 0x302   : > { %v1223_v59 = vsel %vm424_vm4, %v1209_v7, %v1217_v17  ;;  %v1227_v14 = vsel %vm424_vm4, %v1217_v17, %v1209_v7  ;;  %2879 = vmatpush.bf16.msra.mxu3 %v2643_v3  ;;  %v2858_v3 = vld [vmem:[#allocation2 + $0xb4] sm:$0xf]  ;;  %v2611_v4 = vor.u32 %v2835_v51, %v2610_v53  ;;  %v2688_v7 = vld [vmem:[#allocation2 + $0x98] sm:$0xf0] }
 0x303   : > { %v1238_v58 = vmul.f32 %v4149_v12, %v1227_v14  ;;  %v1239_v52 = vmul.f32 %v4151_v8, %v1223_v59  ;;  %1898 = vmatmul.bf16.gmra.mxu3 %v4224_v2  ;;  %v2869_v8 = vld [vmem:[#allocation2 + $0x104] sm:$0xf0]  ;;  %v2707_v17 = vor.u32 %v2858_v3, %v2704_v15  ;;  %v2854_v59 = vld [vmem:[#allocation2 + $0x94] sm:$0xf] }
 0x304   : > { %v2743_v37 = vor.u32 %v2869_v8, %v2742_v18  ;;  %v2691_v14 = vor.u32 %v2854_v59, %v2688_v7 }
 0x305   : > { %v1245_v55 = vpack.c.bf16 %v1239_v52, %v1238_v58  ;;  %1871 = vmatpush.bf16.msrb.mxu1 %v2631_v16  ;;  %1928 = vmatpush.bf16.msra.mxu0 %v2635_v22  ;;  %v2871_v26 = vld [vmem:[#allocation2 + $0x114] sm:$0xf0]  ;;  %v2752_v50 = vld [vmem:[#allocation2 + $0x118] sm:$0xf0]  ;;  %v2680_v58 = vld [vmem:[#allocation2 + $0x88] sm:$0xf0] }
 0x306   : > { %2880 = vmatpush.bf16.msra.mxu3 %v2635_v22  ;;  %v2839_v20 = vld [vmem:[#allocation2 + $0x14] sm:$0xf0]  ;;  %v2751_v27 = vor.u32 %v2871_v26, %v2750_v19  ;;  %v2624_v28 = vld [vmem:[#allocation2 + $0x18] sm:$0xf0]  ;;  %v2755_v45 = vor.u32 %v2870_v42, %v2752_v50  ;;  %v2852_v52 = vld [vmem:[#allocation2 + $0x84] sm:$0xf] }
 0x307   : > { %1249 = vst [vmem:[#allocation2 + $0x8] sm:$0xff] %v1245_v55  ;;  %v2623_v29 = vor.u32 %v2839_v20, %v2622_v41  ;;  %v2627_v12 = vor.u32 %v2838_v11, %v2624_v28  ;;  %v2683_v16 = vor.u32 %v2852_v52, %v2680_v58 }
 0x308   : > { %1910 = vmatpush.bf16.msra.mxu2 %v2751_v27 }
 0x309   : > { %1872 = vmatpush.bf16.msrb.mxu1 %v2623_v29  ;;  %1929 = vmatpush.bf16.msra.mxu0 %v2627_v12  ;;  %v1643_v29 = vpop.permute.xlu1 %1642 }
 0x30a   : > { %2881 = vmatpush.bf16.msra.mxu3 %v2627_v12 }
 0x30c   : > { %1911 = vmatpush.bf16.msra.mxu2 %v2743_v37  ;;  %v1633_v37 = vpop.permute.xlu0 %1632 }
 0x30e   : > { %v2837_v40 = vld [vmem:[#allocation2 + $0x4] sm:$0xf0]  ;;  %v2616_v61 = vld [vmem:[#allocation2 + $0x8] sm:$0xf0] }
 0x30f   : > { %2756 = vmatmul.msk.bf16.vlgmr.msra.gmra.mxu2 %vm1077_vm7, %v2599_v21  ;;  %v2615_v24 = vor.u32 %v2837_v40, %v2614_v60  ;;  %v2619_v36 = vor.u32 %v2836_v34, %v2616_v61 }
 0x310   : > { %2883 = vmatpush.bf16.msrb.mxu2 %v2739_v54 }
 0x311   : > { %1873 = vmatpush.bf16.msrb.mxu1 %v2615_v24  ;;  %1930 = vmatpush.bf16.msra.mxu0 %v2619_v36  ;;  %v1638_v9 = vpop.permute.xlu1 %1637 }
 0x312   : > { %2882 = vmatpush.bf16.msra.mxu3 %v2619_v36 }
 0x314   : > { %2884 = vmatpush.bf16.msrb.mxu2 %v2731_v47  ;;  %1874 = vmatmul.bf16.vlgmr.msrb.gmra.mxu1 %v2591_v46 }
 0x315   : > { %1942 = vmatpush.bf16.msra.mxu1 %v2739_v54  ;;  %1931 = vmatmul.bf16.vlgmr.msra.gmra.mxu0 %v2591_v46 }
 0x316   : > { %1967 = vmatpush.bf16.msrb.mxu3 %v2755_v45 }
 0x317   : > { %1936 = vmatmul.bf16.vlgmr.msra.gmra.mxu3 %v2603_v0 }
 0x318   : > { %2885 = vmatpush.bf16.msrb.mxu2 %v2723_v25 }
 0x319   : > { %1943 = vmatpush.bf16.msra.mxu1 %v2731_v47  ;;  %v1980_v47 = vld [vmem:[%s4405_s6] sm:$0xf] }
 0x31a   : > { %1968 = vmatpush.bf16.msrb.mxu3 %v2747_v48 }
 0x31c   : > { %2886 = vmatpush.bf16.msrb.mxu2 %v2715_v49 }
 0x31d   : > { %1944 = vmatpush.bf16.msra.mxu1 %v2723_v25 }
 0x31f   : > { %2757 = vmatmul.msk.bf16.gmra.mxu2 %vm1077_vm7, %v2611_v4 }
 0x320   : > { %2887 = vmatpush.bf16.msrb.mxu2 %v2707_v17 }
 0x321   : > { %1945 = vmatpush.bf16.msra.mxu1 %v2715_v49 }
 0x324   : > { %2888 = vmatpush.bf16.msrb.mxu2 %v2699_v6  ;;  %1879 = vmatmul.bf16.gmra.mxu1 %v2603_v0 }
 0x325   : > { %1946 = vmatpush.bf16.msra.mxu1 %v2707_v17 }
 0x327   : > { %2758 = vmatmul.msk.bf16.vlgmr.msrb.gmra.mxu3 %vm1077_vm7, %v2599_v21 }
 0x328   : > { %2889 = vmatpush.bf16.msrb.mxu2 %v2691_v14 }
 0x329   : > { %1947 = vmatpush.bf16.msra.mxu1 %v2699_v6 }
 0x32c   : > { %2890 = vmatpush.bf16.msrb.mxu2 %v2683_v16 }
 0x32d   : > { %1948 = vmatpush.bf16.msra.mxu1 %v2691_v14 }
 0x32f   : > { %1955 = vmatmul.bf16.vlgmr.msrb.gmra.mxu2 %v4224_v2  ;;  %v1648_v2 = vpop.permute.xlu2 %1647 }
 0x331   : > { %1949 = vmatpush.bf16.msra.mxu1 %v2683_v16  ;;  %v2872_v16 = vld [vmem:[%s4407_s8] sm:$0xff] }
 0x334   : > { %1950 = vmatmul.bf16.vlgmr.msra.gmra.mxu1 %v4185_v57 }
 0x337   : > { %2759 = vmatmul.msk.bf16.gmra.mxu3 %vm1077_vm7, %v2611_v4  ;;  %v1989_v6 = vpop.permute.xlu2 %1988 }
 0x375   : > { %v1894_v22 = vpop.f32.mrf.mxu3 }
 0x37d   : > { %v1896_v55 = vpop.f32.mrf.mxu3 }
 0x386   : > { %v1899_v41 = vpop.f32.mrf.mxu3 }
 0x38e   : > { %v1901_v19 = vpop.f32.mrf.mxu3 }
 0x391   : > { %v1875_v26 = vpop.f32.mrf.mxu1 }
 0x392   : > { %v1913_v20 = vpop.f32.mrf.mxu2  ;;  %v1876_v54 = vadd.f32 %v1875_v26, %v1633_v37  ;;  %v1932_v40 = vpop.f32.mrf.mxu0  ;;  %v2873_v26 = vld [vmem:[%s4407_s8 + $0x8] sm:$0xff] }
 0x393   : > { %v1933_v48 = vadd.f32 %v1932_v40, %v1633_v37  ;;  %v2045_v37 = vpop.permute.xlu2 %2044 }
 0x394   : > { %v1895_v60 = vadd.f32 %v1894_v22, %v1876_v54 }
 0x396   : > { %v4271_v36 = vadd.f32 %v1913_v20, %v1895_v60 }
 0x399   : > { %v1877_v11 = vpop.f32.mrf.mxu1 }
 0x39a   : > { %v1937_v27 = vpop.f32.mrf.mxu3  ;;  %v1915_v28 = vpop.f32.mrf.mxu2  ;;  %v1878_v31 = vadd.f32 %v1877_v11, %v1638_v9 }
 0x39b   : > { %v1934_v0 = vpop.f32.mrf.mxu0  ;;  %v1938_v38 = vadd.f32 %v1937_v27, %v1643_v29 }
 0x39c   : > { %v1897_v10 = vadd.f32 %v1896_v55, %v1878_v31  ;;  %v1935_v13 = vadd.f32 %v1934_v0, %v1638_v9 }
 0x39e   : > { %v4267_v61 = vadd.f32 %v1915_v28, %v1897_v10  ;;  %v2035_v28 = vpop.permute.xlu0 %2034 }
 0x3a0   : > { %v1981_v46 = vpack.c.bf16 %v4267_v61, %v4271_v36 }
 0x3a1   : > { %v1880_v18 = vpop.f32.mrf.mxu1 }
 0x3a2   : > { %v1939_v12 = vpop.f32.mrf.mxu3  ;;  %v1918_v8 = vpop.f32.mrf.mxu2  ;;  %v1881_v30 = vadd.f32 %v1880_v18, %v1643_v29 }
 0x3a3   : > { %v1940_v25 = vadd.f32 %v1939_v12, %v1648_v2 }
 0x3a4   : > { %v1900_v21 = vadd.f32 %v1899_v41, %v1881_v30 }
 0x3a6   : > { %v4263_v34 = vadd.f32 %v1918_v8, %v1900_v21  ;;  %v2040_v8 = vpop.permute.xlu1 %2039 }
 0x3a9   : > { %v1882_v23 = vpop.f32.mrf.mxu1 }
 0x3aa   : > { %v1970_v57 = vpop.f32.mrf.mxu3  ;;  %v1883_v32 = vadd.f32 %v1882_v23, %v1648_v2  ;;  %v1920_v33 = vpop.f32.mrf.mxu2 }
 0x3ac   : > { %v1902_v62 = vadd.f32 %v1901_v19, %v1883_v32 }
 0x3ae   : > { %v4265_v35 = vadd.f32 %v1920_v33, %v1902_v62 }
 0x3b0   : > { %v1983_v50 = vpack.c.bf16 %v4265_v35, %v4263_v34 }
 0x3b1   : > { %v1951_v63 = vpop.f32.mrf.mxu1 }
 0x3b2   : > { %v1972_v24 = vpop.f32.mrf.mxu3  ;;  %2000 = vmatpush.bf16.msra.mxu2 %v1983_v50  ;;  %v1956_v42 = vpop.f32.mrf.mxu2  ;;  %v1952_v51 = vadd.f32 %v1951_v63, %v1933_v48 }
 0x3b3   : > { %v1957_v44 = vadd.f32 %v1956_v42, %v1938_v38  ;;  %v4298_v63 = vpop.permute.xlu0 %2049 }
 0x3b4   : > { %v4287_v56 = vadd.f32 %v1970_v57, %v1952_v51 }
 0x3b6   : > { %2001 = vmatpush.bf16.msra.mxu2 %v1981_v46 }
 0x3b9   : > { %2760 = vmatmul.msk.bf16.vlgmr.msra.gmra.mxu2 %vm1077_vm7, %v1980_v47  ;;  %v1953_v43 = vpop.f32.mrf.mxu1 }
 0x3ba   : > { %v1975_v45 = vpop.f32.mrf.mxu3  ;;  %v1958_v1 = vpop.f32.mrf.mxu2  ;;  %v1954_v39 = vadd.f32 %v1953_v43, %v1935_v13 }
 0x3bb   : > { %v1959_v49 = vadd.f32 %v1958_v1, %v1940_v25  ;;  %v4279_v15 = vadd.f32 %v1975_v45, %v1957_v44 }
 0x3bc   : > { %v4283_v4 = vadd.f32 %v1972_v24, %v1954_v39 }
 0x3be   : > { %v1982_v5 = vpack.c.bf16 %v4283_v4, %v4287_v56 }
 0x3c2   : > { %v1977_v53 = vpop.f32.mrf.mxu3 }
 0x3c3   : > { %v4281_v3 = vadd.f32 %v1977_v53, %v1959_v49 }
 0x3c5   : > { %v1984_v17 = vpack.c.bf16 %v4281_v3, %v4279_v15 }
 0x3c7   : > { %2013 = vmatpush.bf16.msrb.mxu2 %v1984_v17  ;;  %v2274_v17 = vld [vmem:[%s3300_s20] sm:$0xff] }
 0x3cb   : > { %2014 = vmatpush.bf16.msrb.mxu2 %v1982_v5 }
 0x3ce   : > { %2761 = vmatmul.msk.bf16.vlgmr.msrb.gmra.mxu2 %vm1077_vm7, %v1980_v47 }
 0x43c   : > { %v2003_v7 = vpop.f32.mrf.mxu2 }
 0x43d   : > { %v2004_v59 = vadd.f32 %v2003_v7, %v1989_v6 }
 0x43f   : > { %v2020_v14 = vmax.f32 %v2004_v59, 0.0 }
 0x441   : > { %v2026_v58 = vpack.c.bf16 %v2020_v14, %v2020_v14 }
 0x443   : > { %v2071_v52 = vsel %vm2069_vm9, %v2026_v58, 0 }
 0x444   : > { %2083 = vmatpush.bf16.msrb.mxu0 %v2071_v52  ;;  %v2005_v22 = vpop.f32.mrf.mxu2 }
 0x447   : > { %2770 = vmatmul.msk.bf16.vlgmr.msrb.gmra.mxu0 %vm2062_vm10, %v2872_v16 }
 0x451   : > { %v2016_v55 = vpop.f32.mrf.mxu2 }
 0x452   : > { %v2017_v41 = vadd.f32 %v2016_v55, %v1989_v6 }
 0x454   : > { %v2021_v19 = vmax.f32 %v2017_v41, 0.0 }
 0x456   : > { %v2027_v20 = vpack.c.bf16 %v2021_v19, %v2021_v19 }
 0x457   : > { %2771 = vmatmul.msk.bf16.gmra.mxu0 %vm2062_vm10, %v2873_v26 }
 0x458   : > { %v2074_v27 = vsel %vm2069_vm9, %v2027_v20, 0 }
 0x459   : > { %2102 = vmatpush.bf16.msrb.mxu1 %v2074_v27  ;;  %v2018_v11 = vpop.f32.mrf.mxu2 }
 0x45c   : > { %2772 = vmatmul.msk.bf16.vlgmr.msrb.gmra.mxu1 %vm2062_vm10, %v2872_v16 }
 0x46c   : > { %2773 = vmatmul.msk.bf16.gmra.mxu1 %vm2062_vm10, %v2873_v26 }
 0x4c4   : > { %v2085_v29 = vpop.f32.mrf.mxu0 }
 0x4c5   : > { %v2086_v12 = vadd.f32 %v2085_v29, %v2035_v28 }
 0x4c7   : > { %v2774_v18 = vmul.f32 -1.442695, %v2086_v12 }
 0x4c9   : > { %2963 = vpow2.f32 %v2774_v18  ;;  %v2276_v18 = vld [vmem:[%s3300_s20 + $0x10] sm:$0xff] }
 0x4cc   : > { %v2087_v30 = vpop.f32.mrf.mxu0 }
 0x4cd   : > { %v2088_v9 = vadd.f32 %v2087_v30, %v2040_v8 }
 0x4cf   : > { %v2964_v2 = vpop.eup %2963  ;;  %v2776_v31 = vmul.f32 -1.442695, %v2088_v9 }
 0x4d0   : > { %v2138_v57 = vadd.f32 1.0, %v2964_v2 }
 0x4d1   : > { %2965 = vpow2.f32 %v2776_v31 }
 0x4d2   : > { %2967 = vrcp.f32 %v2138_v57  ;;  %v2155_v42 = vand.u32 2147483647, %v2138_v57  ;;  %v2157_v46 = vand.u32 2147483648, %v2138_v57  ;;  %vm2151_vm12 = vweird.f32 %v2138_v57 }
 0x4d4   : > { %v2090_v23 = vpop.f32.mrf.mxu0  ;;  %v2158_v48 = vor.u32 1.1754944e-38, %v2157_v46  ;;  %vm2156_vm14 = vcmp.eq.f32.partialorder %v2155_v42, 8.507059e+37 }
 0x4d5   : > { %v2091_v54 = vadd.f32 %v2090_v23, %v2045_v37 }
 0x4d7   : > { %v2966_v21 = vpop.eup %2965  ;;  %v2778_v32 = vmul.f32 -1.442695, %v2091_v54 }
 0x4d8   : > { %v2968_v10 = vpop.eup %2967  ;;  %v2140_v62 = vadd.f32 1.0, %v2966_v21 }
 0x4d9   : > { %v2104_v33 = vpop.f32.mrf.mxu1  ;;  %v2147_v40 = vmul.f32 %v2968_v10, %v2138_v57  ;;  %2969 = vpow2.f32 %v2778_v32  ;;  %vm2152_vm11 = vweird.f32 %v2968_v10 }
 0x4da   : > { %v2105_v60 = vadd.f32 %v2104_v33, %v2035_v28  ;;  %2971 = vrcp.f32 %v2140_v62  ;;  %vm2153_vm13 = vmor %vm2151_vm12, %vm2152_vm11  ;;  %v2185_v14 = vand.u32 2147483647, %v2140_v62  ;;  %v2187_v58 = vand.u32 2147483648, %v2140_v62 }
 0x4db   : > { %v2148_v50 = vsub.f32 1.0, %v2147_v40  ;;  %vm2181_vm0 = vweird.f32 %v2140_v62 }
 0x4dc   : > { %v2775_v24 = vmul.f32 -1.442695, %v2105_v60  ;;  %v2092_v47 = vpop.f32.mrf.mxu0  ;;  %v2188_v20 = vor.u32 1.1754944e-38, %v2187_v58  ;;  %vm2186_vm2 = vcmp.eq.f32.partialorder %v2185_v14, 8.507059e+37 }
 0x4dd   : > { %v2149_v45 = vmul.f32 %v2968_v10, %v2148_v50  ;;  %v2093_v0 = vadd.f32 %v2092_v47, %v4298_v63 }
 0x4de   : > { %2973 = vpow2.f32 %v2775_v24 }
 0x4df   : > { %v2970_v43 = vpop.eup %2969  ;;  %v2150_v1 = vadd.f32 %v2968_v10, %v2149_v45  ;;  %v2780_v38 = vmul.f32 -1.442695, %v2093_v0 }
 0x4e0   : > { %v2972_v25 = vpop.eup %2971  ;;  %v2142_v44 = vadd.f32 1.0, %v2970_v43 }
 0x4e1   : > { %v2106_v13 = vpop.f32.mrf.mxu1  ;;  %v2154_v49 = vsel %vm2153_vm13, %v2968_v10, %v2150_v1  ;;  %v2177_v53 = vmul.f32 %v2972_v25, %v2140_v62  ;;  %2975 = vpow2.f32 %v2780_v38  ;;  %vm2182_vm15 = vweird.f32 %v2972_v25  ;;  %v2278_v1 = vld [vmem:[%s3300_s20 + $0x20] sm:$0xff] }
 0x4e2   : > { %v2107_v39 = vadd.f32 %v2106_v13, %v2040_v8  ;;  %v2159_v51 = vsel %vm2156_vm14, %v2158_v48, %v2154_v49  ;;  %2977 = vrcp.f32 %v2142_v44  ;;  %vm2183_vm1 = vmor %vm2181_vm0, %vm2182_vm15  ;;  %v2215_v8 = vand.u32 2147483647, %v2142_v44 }
 0x4e3   : > { %v2266_v6 = vmul.f32 %v2159_v51, %v4271_v36  ;;  %v2178_v7 = vsub.f32 1.0, %v2177_v53  ;;  %v2217_v57 = vand.u32 2147483648, %v2142_v44  ;;  %vm2211_vm4 = vweird.f32 %v2142_v44 }
 0x4e4   : > { %v2974_v5 = vpop.eup %2973  ;;  %v2777_v59 = vmul.f32 -1.442695, %v2107_v39  ;;  %vm4319_vm5 = vcmp.eq.f32.partialorder %v2215_v8, 8.507059e+37 }
 0x4e5   : > { %v4303_v52 = vadd.f32 1.0, %v2974_v5  ;;  %v2282_v16 = vadd.f32 %v2274_v17, %v2266_v6  ;;  %v2179_v22 = vmul.f32 %v2972_v25, %v2178_v7  ;;  %v2218_v24 = vor.u32 1.1754944e-38, %v2217_v57 }
 0x4e6   : > { %2979 = vpow2.f32 %v2777_v59 }
 0x4e7   : > { %2981 = vrcp.f32 %v4303_v52  ;;  %v2976_v55 = vpop.eup %2975  ;;  %v2290_v41 = vmax.f32 %v2282_v16, 0.0  ;;  %v2180_v19 = vadd.f32 %v2972_v25, %v2179_v22  ;;  %v2170_v60 = vand.u32 2147483647, %v4303_v52 }
 0x4e8   : > { %v2978_v36 = vpop.eup %2977  ;;  %v4306_v27 = vadd.f32 1.0, %v2976_v55  ;;  %v2172_v42 = vand.u32 2147483648, %v4303_v52  ;;  %vm2166_vm8 = vweird.f32 %v4303_v52 }
 0x4e9   : > { %v2109_v26 = vpop.f32.mrf.mxu1  ;;  %2298 = vst [vmem:[%s4310_s22] sm:$0xff] %v2290_v41  ;;  %v2184_v28 = vsel %vm2183_vm1, %v2972_v25, %v2180_v19  ;;  %v2207_v29 = vmul.f32 %v2978_v36, %v2142_v44  ;;  %vm2212_vm3 = vweird.f32 %v2978_v36  ;;  %vm2171_vm9 = vcmp.eq.f32.partialorder %v2170_v60, 8.507059e+37 }
 0x4ea   : > { %v2110_v11 = vadd.f32 %v2109_v26, %v2045_v37  ;;  %v2189_v12 = vsel %vm2186_vm2, %v2188_v20, %v2184_v28  ;;  %2983 = vrcp.f32 %v4306_v27  ;;  %vm2213_vm6 = vmor %vm2211_vm4, %vm2212_vm3  ;;  %v2245_v38 = vand.u32 2147483647, %v4306_v27 }
 0x4eb   : > { %v2268_v9 = vmul.f32 %v2189_v12, %v4267_v61  ;;  %v2208_v2 = vsub.f32 1.0, %v2207_v29  ;;  %v2173_v39 = vor.u32 1.1754944e-38, %v2172_v42  ;;  %v2247_v49 = vand.u32 2147483648, %v4306_v27 }
 0x4ec   : > { %v2980_v30 = vpop.eup %2979  ;;  %v2779_v23 = vmul.f32 -1.442695, %v2110_v11  ;;  %vm2241_vm12 = vweird.f32 %v4306_v27  ;;  %vm4339_vm13 = vcmp.eq.f32.partialorder %v2245_v38, 8.507059e+37  ;;  %v2280_v11 = vld [vmem:[%s3300_s20 + $0x30] sm:$0xff] }
 0x4ed   : > { %v2982_v31 = vpop.eup %2981  ;;  %v4316_v37 = vadd.f32 1.0, %v2980_v30  ;;  %v2284_v54 = vadd.f32 %v2276_v18, %v2268_v9  ;;  %v2209_v21 = vmul.f32 %v2978_v36, %v2208_v2  ;;  %v2248_v22 = vor.u32 1.1754944e-38, %v2247_v49 }
 0x4ee   : > { %v2162_v32 = vmul.f32 %v2982_v31, %v4303_v52  ;;  %vm2167_vm7 = vweird.f32 %v2982_v31 }
 0x4ef   : > { %2985 = vrcp.f32 %v4316_v37  ;;  %v2292_v61 = vmax.f32 %v2284_v54, 0.0  ;;  %v2210_v10 = vadd.f32 %v2978_v36, %v2209_v21  ;;  %vm2168_vm10 = vmor %vm2166_vm8, %vm2167_vm7  ;;  %v2200_v55 = vand.u32 2147483647, %v4316_v37 }
 0x4f0   : > { %v2163_v62 = vsub.f32 1.0, %v2162_v32  ;;  %v2984_v50 = vpop.eup %2983  ;;  %2987 = vpow2.f32 %v2779_v23  ;;  %v2202_v41 = vand.u32 2147483648, %v4316_v37  ;;  %vm2196_vm0 = vweird.f32 %v4316_v37 }
 0x4f1   : > { %v2111_v40 = vpop.f32.mrf.mxu1  ;;  %2300 = vst [vmem:[%s4310_s22 + $0x10] sm:$0xff] %v2292_v61  ;;  %v2214_v47 = vsel %vm2213_vm6, %v2978_v36, %v2210_v10  ;;  %v2237_v0 = vmul.f32 %v2984_v50, %v4306_v27  ;;  %vm2242_vm11 = vweird.f32 %v2984_v50  ;;  %vm2201_vm2 = vcmp.eq.f32.partialorder %v2200_v55, 8.507059e+37 }
 0x4f2   : > { %v2112_v46 = vadd.f32 %v2111_v40, %v4298_v63  ;;  %v2164_v45 = vmul.f32 %v2982_v31, %v2163_v62  ;;  %v2219_v43 = vsel %vm4319_vm5, %v2218_v24, %v2214_v47  ;;  %vm2243_vm14 = vmor %vm2241_vm12, %vm2242_vm11  ;;  %v2203_v18 = vor.u32 1.1754944e-38, %v2202_v41 }
 0x4f3   : > { %v2270_v25 = vmul.f32 %v2219_v43, %v4263_v34  ;;  %v2238_v63 = vsub.f32 1.0, %v2237_v0  ;;  %v2275_v34 = vld [vmem:[%s3300_s20 + $0x8] sm:$0xff] }
 0x4f4   : > { %v2781_v13 = vmul.f32 -1.442695, %v2112_v46  ;;  %v2165_v48 = vadd.f32 %v2982_v31, %v2164_v45  ;;  %v2279_v0 = vld [vmem:[%s3300_s20 + $0x28] sm:$0xff] }
 0x4f5   : > { %v2986_v44 = vpop.eup %2985  ;;  %v2286_v53 = vadd.f32 %v2278_v1, %v2270_v25  ;;  %v2239_v17 = vmul.f32 %v2984_v50, %v2238_v63  ;;  %v2281_v63 = vld [vmem:[%s3300_s20 + $0x38] sm:$0xff] }
 0x4f6   : > { %2989 = vpow2.f32 %v2781_v13  ;;  %v2169_v51 = vsel %vm2168_vm10, %v2982_v31, %v2165_v48  ;;  %v2192_v5 = vmul.f32 %v2986_v44, %v4316_v37  ;;  %v2988_v6 = vpop.eup %2987  ;;  %vm2197_vm15 = vweird.f32 %v2986_v44  ;;  %v2277_v31 = vld [vmem:[%s3300_s20 + $0x18] sm:$0xff] }
 0x4f7   : > { %v2174_v7 = vsel %vm2171_vm9, %v2173_v39, %v2169_v51  ;;  %v2294_v14 = vmax.f32 %v2286_v53, 0.0  ;;  %v2240_v52 = vadd.f32 %v2984_v50, %v2239_v17  ;;  %v2143_v19 = vadd.f32 1.0, %v2988_v6  ;;  %vm2198_vm1 = vmor %vm2196_vm0, %vm2197_vm15 }
 0x4f8   : > { %v2267_v58 = vmul.f32 %v2174_v7, %v4287_v56  ;;  %v2193_v16 = vsub.f32 1.0, %v2192_v5 }
 0x4f9   : > { %2302 = vst [vmem:[%s4310_s22 + $0x20] sm:$0xff] %v2294_v14  ;;  %v2244_v36 = vsel %vm2243_vm14, %v2984_v50, %v2240_v52  ;;  %2991 = vrcp.f32 %v2143_v19  ;;  %v2230_v61 = vand.u32 2147483647, %v2143_v19  ;;  %v2232_v10 = vand.u32 2147483648, %v2143_v19 }
 0x4fa   : > { %v2283_v26 = vadd.f32 %v2275_v34, %v2267_v58  ;;  %v2194_v20 = vmul.f32 %v2986_v44, %v2193_v16  ;;  %v2249_v56 = vsel %vm4339_vm13, %v2248_v22, %v2244_v36  ;;  %vm2226_vm4 = vweird.f32 %v2143_v19 }
 0x4fb   : > { %v2272_v29 = vmul.f32 %v2249_v56, %v4265_v35  ;;  %vm2231_vm6 = vcmp.eq.f32.partialorder %v2230_v61, 8.507059e+37 }
 0x4fc   : > { %v2990_v27 = vpop.eup %2989  ;;  %v2291_v28 = vmax.f32 %v2283_v26, 0.0  ;;  %v2195_v12 = vadd.f32 %v2986_v44, %v2194_v20 }
 0x4fd   : > { %v2145_v8 = vadd.f32 1.0, %v2990_v27  ;;  %v2288_v30 = vadd.f32 %v2280_v11, %v2272_v29 }
 0x4fe   : > { %2299 = vst [vmem:[%s4310_s22 + $0x8] sm:$0xff] %v2291_v28  ;;  %v2199_v9 = vsel %vm2198_vm1, %v2986_v44, %v2195_v12 }
 0x4ff   : > { %v2204_v2 = vsel %vm2201_vm2, %v2203_v18, %v2199_v9  ;;  %2993 = vrcp.f32 %v2145_v8  ;;  %v2296_v57 = vmax.f32 %v2288_v30, 0.0  ;;  %v2992_v54 = vpop.eup %2991  ;;  %v2262_v24 = vand.u32 2147483648, %v2145_v8 }
 0x500   : > { %v2269_v23 = vmul.f32 %v2204_v2, %v4283_v4  ;;  %v2222_v21 = vmul.f32 %v2992_v54, %v2143_v19  ;;  %vm2227_vm3 = vweird.f32 %v2992_v54  ;;  %v2233_v4 = vor.u32 1.1754944e-38, %v2232_v10 }
 0x501   : > { %2304 = vst [vmem:[%s4310_s22 + $0x30] sm:$0xff] %v2296_v57  ;;  %vm2228_vm5 = vmor %vm2226_vm4, %vm2227_vm3  ;;  %v2260_v47 = vand.u32 2147483647, %v2145_v8  ;;  %vm2256_vm8 = vweird.f32 %v2145_v8  ;;  %v2263_v38 = vor.u32 1.1754944e-38, %v2262_v24 }
 0x502   : > { %v2285_v35 = vadd.f32 %v2277_v31, %v2269_v23  ;;  %v2223_v37 = vsub.f32 1.0, %v2222_v21 }
 0x503   : > { %vm2261_vm10 = vcmp.eq.f32.partialorder %v2260_v47, 8.507059e+37 }
 0x504   : > { %v2293_v32 = vmax.f32 %v2285_v35, 0.0  ;;  %v2224_v62 = vmul.f32 %v2992_v54, %v2223_v37 }
 0x505   : > { %v2994_v33 = vpop.eup %2993 }
 0x506   : > { %2301 = vst [vmem:[%s4310_s22 + $0x18] sm:$0xff] %v2293_v32  ;;  %v2252_v60 = vmul.f32 %v2994_v33, %v2145_v8  ;;  %v2225_v40 = vadd.f32 %v2992_v54, %v2224_v62  ;;  %vm2257_vm7 = vweird.f32 %v2994_v33 }
 0x507   : > { %vm2258_vm9 = vmor %vm2256_vm8, %vm2257_vm7 }
 0x508   : > { %v2253_v50 = vsub.f32 1.0, %v2252_v60  ;;  %v2229_v42 = vsel %vm2228_vm5, %v2992_v54, %v2225_v40 }
 0x509   : > { %v2234_v45 = vsel %vm2231_vm6, %v2233_v4, %v2229_v42 }
 0x50a   : > { %v2254_v46 = vmul.f32 %v2994_v33, %v2253_v50  ;;  %v2271_v43 = vmul.f32 %v2234_v45, %v4279_v15 }
 0x50c   : > { %v2255_v1 = vadd.f32 %v2994_v33, %v2254_v46  ;;  %v2287_v13 = vadd.f32 %v2279_v0, %v2271_v43 }
 0x50e   : > { %v2259_v25 = vsel %vm2258_vm9, %v2994_v33, %v2255_v1  ;;  %v2295_v44 = vmax.f32 %v2287_v13, 0.0 }
 0x50f   : > { %v2264_v48 = vsel %vm2261_vm10, %v2263_v38, %v2259_v25 }
 0x510   : > { %v2273_v39 = vmul.f32 %v2264_v48, %v4281_v3  ;;  %2303 = vst [vmem:[%s4310_s22 + $0x28] sm:$0xff] %v2295_v44 }
 0x512   : > { %v2289_v15 = vadd.f32 %v2281_v63, %v2273_v39 }
 0x514   : > { %v2297_v49 = vmax.f32 %v2289_v15, 0.0 }
 0x516   : > { %2305 = vst [vmem:[%s4310_s22 + $0x38] sm:$0xff] %v2297_v49 }
 0x517   : > { %3082 = shalt.err (!%p3079_p10)
}
 0x518   : > { %s3139_s1 = smov 256  }
 0x519   : > { %2897 = dma.vmem_to_hbm [thread:$0]  (%p3264_p3), %s2320_s17, 1024, %s2322_s26, %s2307_s21, %s3139_s1, %s3139_s1, %s3132_s28  }
 0x51a PF: > { %s2336_s23 = sand.u32 1, %s3113_s13   ;;  %p4442_p12 = scmp.ge.s32.totalorder %s3125_s16, 2 }
 0x51b   : > { %s2337_s15 = scalar_lea.sflag [#allocation5], %s2336_s23 }
 0x51c   : > { %p2908_p13 = pnand %p4442_p12, %p3230_p6 }
 0x51e   : > { %p2909_p0 = pneg %p2908_p13 }
 0x520   : > { %3108 = dma.done.wait (%p2909_p0), %s2337_s15, 1024  }
 0x521   : > { %3110 = vsyncadd (%p2909_p0), %s2337_s15, 4294966272  ;;  %s4443_s29 = sld [smem:[#allocation12_spill]]  ;;  %p24_p5 = scmp.ge.s32.totalorder %s3248_s27, 4  }
 0x522   : > { %s4444_s15 = sld [smem:[#allocation14_spill]]  ;;  %s4445_s13 = smov %s3117_s14 }
 0x523   : > { %s4447_s16 = smov %s3248_s27  ;;  %26 = sbr.rel (!%p24_p5) target bundleno = 8 (0x8), region = 116 }
 0x527   : > { %s4446_s14 = smov %s4443_s29 }
 0x528   :  { %2343 = vsyncpa [#allocation4], 1 }
 0x529   :  { %2345 = vsyncpa [#allocation4 + $0x1], 1 }
 0x52a   :  { %2346 = vsyncpa [#allocation7], 1 }
 0x52b   :  { %2347 = vsyncpa [#allocation5], 1 }
 0x52c   :  { %2349 = vsyncpa [#allocation5 + $0x1], 1 }

</bundles_post_ra>
